<compile_context>
chip_gen: v6e
topology: v6e:2x2x1
jax: 0.10.0
libtpu: 0.0.40
codegen_flags: <defaults>
</compile_context>

<pallas_src>
import functools

import jax
import jax.numpy as jnp
from jax import lax
from jax.experimental import pallas as pl
from jax.experimental.pallas import tpu as pltpu


# ------------------------------- the kernel --------------------------------

def resnet_block_kernel(x_ref, p_in_ref, p_out_ref, a_in_ref, a_out_ref,
                        w1_ref, w2_ref, wn_ref, o_ref, *,
                        cpg_in, cpg_out, L, B_tile, has_nin, conv_dtype, eps):
    f32 = jnp.float32

    # Packed per-channel params (columns): resident, loaded once per step.
    gamma1 = p_in_ref[:, 0:1]        # (Cin, 1)
    beta1 = p_in_ref[:, 1:2]
    gamma2 = p_out_ref[:, 0:1]       # (Cout, 1)
    beta2 = p_out_ref[:, 1:2]
    b1 = p_out_ref[:, 2:3]
    b2 = p_out_ref[:, 3:4]           # b2 (+ b_nin folded in on host)

    # Per-sample views of the input tile; GroupNorm math stays in f32.
    xs = [x_ref[b].astype(f32) for b in range(B_tile)]          # Bt x (Cin, L)

    def gn_swish(hs, a_ref, cpg, gamma, beta):
        """Per-sample GroupNorm (two-pass / centered variance) + swish, f32.

        hs: list of B_tile (C, L) f32 arrays.
        a_ref: (C, C) group-mean matrix (1/(cpg*L) within a group) -> one tiny
               resident matmul does group-sum AND broadcast-back to channels.
        """
        inv_n = 1.0 / float(cpg * L)
        # Per-(channel, sample) sums: lane reductions (XLU), no stats matmul.
        s = jnp.concatenate(
            [jnp.sum(h, axis=1, keepdims=True) for h in hs], axis=1)   # (C, Bt)
        if cpg > 1:
            mean = jnp.dot(a_ref[...], s, preferred_element_type=f32)  # (C, Bt)
        else:
            mean = s * inv_n
        hcs = [h - mean[:, b:b + 1] for b, h in enumerate(hs)]
        v = jnp.concatenate(
            [jnp.sum(hc * hc, axis=1, keepdims=True) for hc in hcs], axis=1)
        if cpg > 1:
            var = jnp.dot(a_ref[...], v, preferred_element_type=f32)
        else:
            var = v * inv_n
        scale = lax.rsqrt(var + eps) * gamma                           # (C, Bt)
        out = []
        for b, hc in enumerate(hcs):
            y = hc * scale[:, b:b + 1] + beta
            out.append(y * jax.nn.sigmoid(y))                          # swish
        return out

    def conv3(hs, w_ref, bias, extra=None):
        """Conv1d(k=3, padding=1) as 3 MXU matmuls per sample.

        hs: list of B_tile (C, L) conv_dtype arrays.  w_ref: (3, O, C).
        extra: (w_nin (O, Cin), list of (Cin, L)) to fuse the 1x1 shortcut.
        """
        C = hs[0].shape[0]
        # Boundary masks built once per conv, reused across the batch loop.
        lane = lax.broadcasted_iota(jnp.int32, (C, L), 1)
        m_first = lane == 0
        m_last = lane == L - 1
        zero = jnp.zeros((C, L), hs[0].dtype)
        w_l, w_c, w_r = w_ref[0], w_ref[1], w_ref[2]      # loaded once
        if extra is not None:
            w_n = extra[0]
        outs = []
        for b, hb in enumerate(hs):
            left = jnp.where(m_first, zero, pltpu.roll(hb, 1, axis=1))
            right = jnp.where(m_last, zero, pltpu.roll(hb, L - 1, axis=1))
            acc = jnp.dot(w_c, hb, preferred_element_type=f32)
            acc = acc + jnp.dot(w_l, left, preferred_element_type=f32)
            acc = acc + jnp.dot(w_r, right, preferred_element_type=f32)
            if extra is not None:
                acc = acc + jnp.dot(w_n, extra[1][b], preferred_element_type=f32)
            outs.append(acc + bias)                        # (O, L) f32
        return outs

    # norm1 -> swish -> conv1
    h = gn_swish(xs, a_in_ref, cpg_in, gamma1, beta1)
    h = [y.astype(conv_dtype) for y in h]          # single downcast before taps
    h = conv3(h, w1_ref, b1)

    # norm2 -> swish -> conv2 (+ fused 1x1 shortcut)
    h = gn_swish(h, a_out_ref, cpg_out, gamma2, beta2)
    h = [y.astype(conv_dtype) for y in h]
    if has_nin:
        # NOTE: the 1x1 shortcut goes through the conv_dtype matmul (small
        # precision asymmetry vs. the f32 identity path when conv_dtype=bf16).
        xc = [xb.astype(conv_dtype) for xb in xs]
        out = conv3(h, w2_ref, b2, extra=(wn_ref[...], xc))
    else:
        out = conv3(h, w2_ref, b2)
        out = [o + xb for o, xb in zip(out, xs)]   # identity shortcut in f32

    for b in range(B_tile):
        o_ref[b] = out[b].astype(o_ref.dtype)


# -------------------------------- wrapper ----------------------------------

def _group_mean_matrix(C, num_groups, L, dtype=jnp.float32):
    cpg = C // num_groups
    g = jnp.arange(C) // cpg
    return (g[:, None] == g[None, :]).astype(dtype) / float(cpg * L)   # (C, C)


def resnet_block_pallas(x, params, num_groups=32, batch_tile=None,
                        conv_dtype=jnp.bfloat16, eps=1e-6):
    """x: (B, Cin, L), same NCL layout and dtype convention as the PyTorch module."""
    B, Cin, L = x.shape
    w1 = params["w1"]                                  # (Cout, Cin, 3)
    w2 = params["w2"]                                  # (Cout, Cout, 3)
    Cout = w1.shape[0]
    has_nin = "w_nin" in params
    if Cin % num_groups or Cout % num_groups:
        raise ValueError("channels must be divisible by num_groups")
    if L % 128:
        # TODO(synk): L-tiling with k=3 halo exchange between length tiles.
        raise ValueError("L must be a multiple of 128 (single lane-aligned tile)")
    if Cin != Cout and not has_nin:
        raise ValueError("w_nin/b_nin required when in_channels != out_channels")
    cpg_in, cpg_out = Cin // num_groups, Cout // num_groups
    itemsize = jnp.dtype(x.dtype).itemsize

    # ---- VMEM-aware batch tile (v7x has 64 MiB/TC vs 128 MiB on v5e/v6e) ----
    try:
        vmem_cap = int(pltpu.get_tpu_info().vmem_capacity_bytes)
    except Exception:
        vmem_cap = 64 * 1024 * 1024
    per_batch = (5 * Cin + 7 * Cout) * L * 4 + 2 * (Cin + Cout) * L * itemsize
    if batch_tile is None:
        cap = max(1, min(8,                               # bound trace-time unroll
                         (vmem_cap // 4) // max(per_batch, 1),
                         B // 4 if B >= 4 else 1))        # >=4 grid steps when possible
        bt = 1
        for d in range(int(cap), 0, -1):                  # prefer a divisor of B
            if B % d == 0:
                bt = d
                break
    else:
        bt = max(1, min(int(batch_tile), B))
    Bp = pl.cdiv(B, bt) * bt
    xp = jnp.pad(x, ((0, Bp - B), (0, 0), (0, 0))) if Bp != B else x
    # (Padded rows only produce wasted-but-finite work; they are sliced off.)

    # ---- tiny host-side packing (one-time, no activation-sized copies) ----
    w1_k = jnp.transpose(w1, (2, 0, 1)).astype(conv_dtype)      # (3, Cout, Cin)
    w2_k = jnp.transpose(w2, (2, 0, 1)).astype(conv_dtype)      # (3, Cout, Cout)
    b2 = params["b2"]
    if has_nin:
        wn = params["w_nin"].astype(conv_dtype)                 # (Cout, Cin)
        b2 = b2 + params["b_nin"]
    else:
        wn = jnp.zeros((8, 128), conv_dtype)                    # unread placeholder
    p_in = jnp.stack([params["gamma1"], params["beta1"]],
                     axis=1).astype(jnp.float32)                # (Cin, 2)
    p_out = jnp.stack([params["gamma2"], params["beta2"],
                       params["b1"], b2], axis=1).astype(jnp.float32)   # (Cout, 4)
    a_in = _group_mean_matrix(Cin, num_groups, L)               # (Cin, Cin)
    a_out = _group_mean_matrix(Cout, num_groups, L)             # (Cout, Cout)

    kernel = functools.partial(
        resnet_block_kernel, cpg_in=cpg_in, cpg_out=cpg_out, L=L, B_tile=bt,
        has_nin=has_nin, conv_dtype=conv_dtype, eps=eps)

    vmem_limit = int(min(vmem_cap * 3 // 4, max(32 * 1024 * 1024, 4 * bt * per_batch)))

    out = pl.pallas_call(
        kernel,
        out_shape=jax.ShapeDtypeStruct((Bp, Cout, L), x.dtype),
        grid_spec=pltpu.PrefetchScalarGridSpec(
            num_scalar_prefetch=0,
            grid=(Bp // bt,),
            in_specs=[
                pl.BlockSpec((bt, Cin, L), lambda i: (i, 0, 0)),     # x batch tile
                pl.BlockSpec(p_in.shape, lambda i: (0, 0)),          # GN1 params (resident)
                pl.BlockSpec(p_out.shape, lambda i: (0, 0)),         # GN2 + bias params
                pl.BlockSpec(a_in.shape, lambda i: (0, 0)),          # group-mean matrix 1
                pl.BlockSpec(a_out.shape, lambda i: (0, 0)),         # group-mean matrix 2
                pl.BlockSpec(w1_k.shape, lambda i: (0, 0, 0)),       # conv1 taps
                pl.BlockSpec(w2_k.shape, lambda i: (0, 0, 0)),       # conv2 taps
                pl.BlockSpec(wn.shape, lambda i: (0, 0)),            # 1x1 shortcut
            ],
            out_specs=pl.BlockSpec((bt, Cout, L), lambda i: (i, 0, 0)),
        ),
        compiler_params=pltpu.CompilerParams(
            dimension_semantics=("parallel",),
            vmem_limit_bytes=vmem_limit),
    )(xp, p_in, p_out, a_in, a_out, w1_k, w2_k, wn)
    return out[:B] if Bp != B else out


# ------------------------- pure-JAX reference ------------------------------

def resnet_block_ref(x, params, num_groups=32, eps=1e-6):
    def gn(h, gamma, beta):
        B, C, L = h.shape
        hg = h.reshape(B, num_groups, (C // num_groups) * L)
        mean = hg.mean(-1, keepdims=True)
        var = hg.var(-1, keepdims=True)
        hg = (hg - mean) / jnp.sqrt(var + eps)
        h = hg.reshape(B, C, L)
        return h * gamma[None, :, None] + beta[None, :, None]

    def conv1d(h, w, b, pad):
        out = lax.conv_general_dilated(
            h, w, window_strides=(1,), padding=[(pad, pad)],
            dimension_numbers=("NCH", "OIH", "NCH"))
        return out + b[None, :, None]

    h = gn(x, params["gamma1"], params["beta1"])
    h = h * jax.nn.sigmoid(h)
    h = conv1d(h, params["w1"], params["b1"], pad=1)
    h = gn(h, params["gamma2"], params["beta2"])
    h = h * jax.nn.sigmoid(h)
    h = conv1d(h, params["w2"], params["b2"], pad=1)
    if "w_nin" in params:
        sc = conv1d(x, params["w_nin"][:, :, None], params["b_nin"], pad=0)
    else:
        sc = x
    return sc + h


# ---------------------------------- main -----------------------------------

if __name__ == "__main__":
    key = jax.random.PRNGKey(0)

    # ---- case 1: Cin != Cout (1x1 nin shortcut), GroupNorm(32) / L % 128 == 0
    B, Cin, Cout, L = 8, 32, 64, 128
    ks = jax.random.split(key, 11)
    x = jax.random.normal(ks[0], (B, Cin, L), dtype=jnp.float32)
    params = {
        "gamma1": 1.0 + 0.1 * jax.random.normal(ks[1], (Cin,), jnp.float32),
        "beta1": 0.1 * jax.random.normal(ks[2], (Cin,), jnp.float32),
        "w1": 0.1 * jax.random.normal(ks[3], (Cout, Cin, 3), jnp.float32),
        "b1": 0.1 * jax.random.normal(ks[4], (Cout,), jnp.float32),
        "gamma2": 1.0 + 0.1 * jax.random.normal(ks[5], (Cout,), jnp.float32),
        "beta2": 0.1 * jax.random.normal(ks[6], (Cout,), jnp.float32),
        "w2": 0.1 * jax.random.normal(ks[7], (Cout, Cout, 3), jnp.float32),
        "b2": 0.1 * jax.random.normal(ks[8], (Cout,), jnp.float32),
        "w_nin": 0.1 * jax.random.normal(ks[9], (Cout, Cin), jnp.float32),
        "b_nin": jnp.zeros((Cout,), jnp.float32),
    }
    ref = jax.block_until_ready(resnet_block_ref(x, params))

    out_f32 = jax.block_until_ready(
        resnet_block_pallas(x, params, conv_dtype=jnp.float32))
    assert out_f32.shape == (B, Cout, L), out_f32.shape
    if not jnp.allclose(out_f32, ref, atol=2e-4, rtol=2e-4):
        raise AssertionError(
            f"f32 mismatch: max abs err = {float(jnp.max(jnp.abs(out_f32 - ref)))}")

    out_bf16 = jax.block_until_ready(resnet_block_pallas(x, params))
    assert out_bf16.shape == (B, Cout, L), out_bf16.shape
    if not jnp.allclose(out_bf16, ref, atol=1e-1, rtol=1e-1):
        raise AssertionError(
            f"bf16 mismatch: max abs err = {float(jnp.max(jnp.abs(out_bf16 - ref)))}")

    # ---- case 2: Cin == Cout (identity shortcut), odd-ish batch (B_tile = 1)
    B2, C2 = 6, 32
    ks2 = jax.random.split(jax.random.PRNGKey(1), 9)
    x2 = jax.random.normal(ks2[0], (B2, C2, L), dtype=jnp.float32)
    params2 = {
        "gamma1": 1.0 + 0.1 * jax.random.normal(ks2[1], (C2,), jnp.float32),
        "beta1": 0.1 * jax.random.normal(ks2[2], (C2,), jnp.float32),
        "w1": 0.1 * jax.random.normal(ks2[3], (C2, C2, 3), jnp.float32),
        "b1": 0.1 * jax.random.normal(ks2[4], (C2,), jnp.float32),
        "gamma2": 1.0 + 0.1 * jax.random.normal(ks2[5], (C2,), jnp.float32),
        "beta2": 0.1 * jax.random.normal(ks2[6], (C2,), jnp.float32),
        "w2": 0.1 * jax.random.normal(ks2[7], (C2, C2, 3), jnp.float32),
        "b2": 0.1 * jax.random.normal(ks2[8], (C2,), jnp.float32),
    }
    ref2 = jax.block_until_ready(resnet_block_ref(x2, params2))
    out2 = jax.block_until_ready(
        resnet_block_pallas(x2, params2, conv_dtype=jnp.float32))
    assert out2.shape == (B2, C2, L), out2.shape
    if not jnp.allclose(out2, ref2, atol=2e-4, rtol=2e-4):
        raise AssertionError(
            f"identity-path mismatch: max abs err = "
            f"{float(jnp.max(jnp.abs(out2 - ref2)))}")

    print("KERNEL_OK")
</pallas_src>

<mosaic_0001>
module attributes {stable_mosaic.version = 11 : i64} {
  func.func @resnet_block_kernel(%arg0: i32, %arg1: memref<2x32x128xf32, #tpu.memory_space<vmem>>, %arg2: memref<32x2xf32, #tpu.memory_space<vmem>>, %arg3: memref<64x4xf32, #tpu.memory_space<vmem>>, %arg4: memref<32x32xf32, #tpu.memory_space<vmem>>, %arg5: memref<64x64xf32, #tpu.memory_space<vmem>>, %arg6: memref<3x64x32xf32, #tpu.memory_space<vmem>>, %arg7: memref<3x64x64xf32, #tpu.memory_space<vmem>>, %arg8: memref<64x32xf32, #tpu.memory_space<vmem>>, %arg9: memref<2x64x128xf32, #tpu.memory_space<vmem>>) attributes {dimension_semantics = [#tpu.dimension_semantics<parallel>], iteration_bounds = array<i64: 4>, scalar_prefetch = 0 : i64, scratch_operands = 0 : i64, tpu.core_type = #tpu.core_type<tc>, window_params = [{transform_indices = @transform_0, window_bounds = array<i64: 2, 32, 128>}, {pipeline_mode = #tpu.pipeline_mode<synchronous>, transform_indices = @transform_1, window_bounds = array<i64: 32, 2>}, {pipeline_mode = #tpu.pipeline_mode<synchronous>, transform_indices = @transform_2, window_bounds = array<i64: 64, 4>}, {pipeline_mode = #tpu.pipeline_mode<synchronous>, transform_indices = @transform_3, window_bounds = array<i64: 32, 32>}, {pipeline_mode = #tpu.pipeline_mode<synchronous>, transform_indices = @transform_4, window_bounds = array<i64: 64, 64>}, {pipeline_mode = #tpu.pipeline_mode<synchronous>, transform_indices = @transform_5, window_bounds = array<i64: 3, 64, 32>}, {pipeline_mode = #tpu.pipeline_mode<synchronous>, transform_indices = @transform_6, window_bounds = array<i64: 3, 64, 64>}, {pipeline_mode = #tpu.pipeline_mode<synchronous>, transform_indices = @transform_7, window_bounds = array<i64: 64, 32>}, {transform_indices = @transform_8, window_bounds = array<i64: 2, 64, 128>}]} {
    %c0 = arith.constant 0 : index
    %c0_0 = arith.constant 0 : index
    %0 = vector.load %arg2[%c0, %c0_0] : memref<32x2xf32, #tpu.memory_space<vmem>>, vector<32x1xf32>
    %c0_1 = arith.constant 0 : index
    %c1 = arith.constant 1 : index
    %1 = vector.load %arg2[%c0_1, %c1] : memref<32x2xf32, #tpu.memory_space<vmem>>, vector<32x1xf32>
    %c0_2 = arith.constant 0 : index
    %c0_3 = arith.constant 0 : index
    %2 = vector.load %arg3[%c0_2, %c0_3] : memref<64x4xf32, #tpu.memory_space<vmem>>, vector<64x1xf32>
    %c0_4 = arith.constant 0 : index
    %c1_5 = arith.constant 1 : index
    %3 = vector.load %arg3[%c0_4, %c1_5] : memref<64x4xf32, #tpu.memory_space<vmem>>, vector<64x1xf32>
    %c0_6 = arith.constant 0 : index
    %c2 = arith.constant 2 : index
    %4 = vector.load %arg3[%c0_6, %c2] : memref<64x4xf32, #tpu.memory_space<vmem>>, vector<64x1xf32>
    %c0_7 = arith.constant 0 : index
    %c3 = arith.constant 3 : index
    %5 = vector.load %arg3[%c0_7, %c3] : memref<64x4xf32, #tpu.memory_space<vmem>>, vector<64x1xf32>
    %c0_8 = arith.constant 0 : index
    %c0_9 = arith.constant 0 : index
    %c0_10 = arith.constant 0 : index
    %6 = vector.load %arg1[%c0_8, %c0_9, %c0_10] : memref<2x32x128xf32, #tpu.memory_space<vmem>>, vector<1x32x128xf32>
    %7 = vector.shape_cast %6 : vector<1x32x128xf32> to vector<32x128xf32>
    %c1_11 = arith.constant 1 : index
    %c0_12 = arith.constant 0 : index
    %c0_13 = arith.constant 0 : index
    %8 = vector.load %arg1[%c1_11, %c0_12, %c0_13] : memref<2x32x128xf32, #tpu.memory_space<vmem>>, vector<1x32x128xf32>
    %9 = vector.shape_cast %8 : vector<1x32x128xf32> to vector<32x128xf32>
    %cst = arith.constant dense<0.000000e+00> : vector<32xf32>
    %10 = vector.multi_reduction <add>, %7, %cst [1] : vector<32x128xf32> to vector<32xf32>
    %11 = vector.shape_cast %10 : vector<32xf32> to vector<32x1xf32>
    %cst_14 = arith.constant dense<0.000000e+00> : vector<32xf32>
    %12 = vector.multi_reduction <add>, %9, %cst_14 [1] : vector<32x128xf32> to vector<32xf32>
    %13 = vector.shape_cast %12 : vector<32xf32> to vector<32x1xf32>
    %14 = tpu.concatenate %11, %13 in 1 : vector<32x1xf32>, vector<32x1xf32> -> vector<32x2xf32>
    %cst_15 = arith.constant 7.812500e-03 : f32
    %15 = vector.broadcast %cst_15 : f32 to vector<32x2xf32>
    %16 = arith.mulf %14, %15 : vector<32x2xf32>
    %17 = vector.extract_strided_slice %16 {offsets = [0, 0], sizes = [32, 1], strides = [1, 1]} : vector<32x2xf32> to vector<32x1xf32>
    %18 = vector.broadcast %17 : vector<32x1xf32> to vector<32x128xf32>
    %19 = arith.subf %7, %18 : vector<32x128xf32>
    %20 = vector.extract_strided_slice %16 {offsets = [0, 1], sizes = [32, 1], strides = [1, 1]} : vector<32x2xf32> to vector<32x1xf32>
    %21 = vector.broadcast %20 : vector<32x1xf32> to vector<32x128xf32>
    %22 = arith.subf %9, %21 : vector<32x128xf32>
    %23 = arith.mulf %19, %19 : vector<32x128xf32>
    %cst_16 = arith.constant dense<0.000000e+00> : vector<32xf32>
    %24 = vector.multi_reduction <add>, %23, %cst_16 [1] : vector<32x128xf32> to vector<32xf32>
    %25 = vector.shape_cast %24 : vector<32xf32> to vector<32x1xf32>
    %26 = arith.mulf %22, %22 : vector<32x128xf32>
    %cst_17 = arith.constant dense<0.000000e+00> : vector<32xf32>
    %27 = vector.multi_reduction <add>, %26, %cst_17 [1] : vector<32x128xf32> to vector<32xf32>
    %28 = vector.shape_cast %27 : vector<32xf32> to vector<32x1xf32>
    %29 = tpu.concatenate %25, %28 in 1 : vector<32x1xf32>, vector<32x1xf32> -> vector<32x2xf32>
    %cst_18 = arith.constant 7.812500e-03 : f32
    %30 = vector.broadcast %cst_18 : f32 to vector<32x2xf32>
    %31 = arith.mulf %29, %30 : vector<32x2xf32>
    %cst_19 = arith.constant 9.99999997E-7 : f32
    %32 = vector.broadcast %cst_19 : f32 to vector<32x2xf32>
    %33 = arith.addf %31, %32 : vector<32x2xf32>
    %34 = math.rsqrt %33 : vector<32x2xf32>
    %35 = vector.broadcast %0 : vector<32x1xf32> to vector<32x2xf32>
    %36 = arith.mulf %34, %35 : vector<32x2xf32>
    %37 = vector.extract_strided_slice %36 {offsets = [0, 0], sizes = [32, 1], strides = [1, 1]} : vector<32x2xf32> to vector<32x1xf32>
    %38 = vector.broadcast %37 : vector<32x1xf32> to vector<32x128xf32>
    %39 = arith.mulf %19, %38 : vector<32x128xf32>
    %40 = vector.broadcast %1 : vector<32x1xf32> to vector<32x128xf32>
    %41 = arith.addf %39, %40 : vector<32x128xf32>
    %42 = arith.negf %41 : vector<32x128xf32>
    %43 = math.exp %42 : vector<32x128xf32>
    %cst_20 = arith.constant 1.000000e+00 : f32
    %44 = vector.broadcast %cst_20 : f32 to vector<32x128xf32>
    %45 = arith.addf %44, %43 : vector<32x128xf32>
    %46 = arith.divf %44, %45 : vector<32x128xf32>
    %47 = arith.mulf %41, %46 : vector<32x128xf32>
    %48 = vector.extract_strided_slice %36 {offsets = [0, 1], sizes = [32, 1], strides = [1, 1]} : vector<32x2xf32> to vector<32x1xf32>
    %49 = vector.broadcast %48 : vector<32x1xf32> to vector<32x128xf32>
    %50 = arith.mulf %22, %49 : vector<32x128xf32>
    %51 = vector.broadcast %1 : vector<32x1xf32> to vector<32x128xf32>
    %52 = arith.addf %50, %51 : vector<32x128xf32>
    %53 = arith.negf %52 : vector<32x128xf32>
    %54 = math.exp %53 : vector<32x128xf32>
    %cst_21 = arith.constant 1.000000e+00 : f32
    %55 = vector.broadcast %cst_21 : f32 to vector<32x128xf32>
    %56 = arith.addf %55, %54 : vector<32x128xf32>
    %57 = arith.divf %55, %56 : vector<32x128xf32>
    %58 = arith.mulf %52, %57 : vector<32x128xf32>
    %59 = tpu.iota {dimensions = array<i32: 1>} : vector<32x128xi32>
    %c0_i32 = arith.constant 0 : i32
    %60 = vector.broadcast %c0_i32 : i32 to vector<32x128xi32>
    %61 = arith.cmpi eq, %59, %60 : vector<32x128xi32>
    %c127_i32 = arith.constant 127 : i32
    %62 = vector.broadcast %c127_i32 : i32 to vector<32x128xi32>
    %63 = arith.cmpi eq, %59, %62 : vector<32x128xi32>
    %cst_22 = arith.constant 0.000000e+00 : f32
    %64 = vector.broadcast %cst_22 : f32 to vector<32x128xf32>
    %c0_23 = arith.constant 0 : index
    %c0_24 = arith.constant 0 : index
    %c0_25 = arith.constant 0 : index
    %65 = vector.load %arg6[%c0_23, %c0_24, %c0_25] : memref<3x64x32xf32, #tpu.memory_space<vmem>>, vector<1x64x32xf32>
    %66 = vector.shape_cast %65 : vector<1x64x32xf32> to vector<64x32xf32>
    %c1_26 = arith.constant 1 : index
    %c0_27 = arith.constant 0 : index
    %c0_28 = arith.constant 0 : index
    %67 = vector.load %arg6[%c1_26, %c0_27, %c0_28] : memref<3x64x32xf32, #tpu.memory_space<vmem>>, vector<1x64x32xf32>
    %68 = vector.shape_cast %67 : vector<1x64x32xf32> to vector<64x32xf32>
    %c2_29 = arith.constant 2 : index
    %c0_30 = arith.constant 0 : index
    %c0_31 = arith.constant 0 : index
    %69 = vector.load %arg6[%c2_29, %c0_30, %c0_31] : memref<3x64x32xf32, #tpu.memory_space<vmem>>, vector<1x64x32xf32>
    %70 = vector.shape_cast %69 : vector<1x64x32xf32> to vector<64x32xf32>
    %c1_i32 = arith.constant 1 : i32
    %71 = tpu.dynamic_rotate %47 by %c1_i32 dim 1 : vector<32x128xf32>, i32 -> vector<32x128xf32>
    %72 = arith.select %61, %64, %71 : vector<32x128xi1>, vector<32x128xf32>
    %c127_i32_32 = arith.constant 127 : i32
    %73 = tpu.dynamic_rotate %47 by %c127_i32_32 dim 1 : vector<32x128xf32>, i32 -> vector<32x128xf32>
    %74 = arith.select %63, %64, %73 : vector<32x128xi1>, vector<32x128xf32>
    %cst_33 = arith.constant dense<0.000000e+00> : vector<64x128xf32>
    %75 = tpu.matmul %68, %47, %cst_33 {dimension_numbers = #tpu.dot_dimension_numbers<[1], [0], [0], [1], [0, 0, 1, 1], [], []>} : vector<64x32xf32>, vector<32x128xf32>, vector<64x128xf32> -> vector<64x128xf32>
    %cst_34 = arith.constant dense<0.000000e+00> : vector<64x128xf32>
    %76 = tpu.matmul %66, %72, %cst_34 {dimension_numbers = #tpu.dot_dimension_numbers<[1], [0], [0], [1], [0, 0, 1, 1], [], []>} : vector<64x32xf32>, vector<32x128xf32>, vector<64x128xf32> -> vector<64x128xf32>
    %77 = arith.addf %75, %76 : vector<64x128xf32>
    %cst_35 = arith.constant dense<0.000000e+00> : vector<64x128xf32>
    %78 = tpu.matmul %70, %74, %cst_35 {dimension_numbers = #tpu.dot_dimension_numbers<[1], [0], [0], [1], [0, 0, 1, 1], [], []>} : vector<64x32xf32>, vector<32x128xf32>, vector<64x128xf32> -> vector<64x128xf32>
    %79 = arith.addf %77, %78 : vector<64x128xf32>
    %80 = vector.broadcast %4 : vector<64x1xf32> to vector<64x128xf32>
    %81 = arith.addf %79, %80 : vector<64x128xf32>
    %c1_i32_36 = arith.constant 1 : i32
    %82 = tpu.dynamic_rotate %58 by %c1_i32_36 dim 1 : vector<32x128xf32>, i32 -> vector<32x128xf32>
    %83 = arith.select %61, %64, %82 : vector<32x128xi1>, vector<32x128xf32>
    %c127_i32_37 = arith.constant 127 : i32
    %84 = tpu.dynamic_rotate %58 by %c127_i32_37 dim 1 : vector<32x128xf32>, i32 -> vector<32x128xf32>
    %85 = arith.select %63, %64, %84 : vector<32x128xi1>, vector<32x128xf32>
    %cst_38 = arith.constant dense<0.000000e+00> : vector<64x128xf32>
    %86 = tpu.matmul %68, %58, %cst_38 {dimension_numbers = #tpu.dot_dimension_numbers<[1], [0], [0], [1], [0, 0, 1, 1], [], []>} : vector<64x32xf32>, vector<32x128xf32>, vector<64x128xf32> -> vector<64x128xf32>
    %cst_39 = arith.constant dense<0.000000e+00> : vector<64x128xf32>
    %87 = tpu.matmul %66, %83, %cst_39 {dimension_numbers = #tpu.dot_dimension_numbers<[1], [0], [0], [1], [0, 0, 1, 1], [], []>} : vector<64x32xf32>, vector<32x128xf32>, vector<64x128xf32> -> vector<64x128xf32>
    %88 = arith.addf %86, %87 : vector<64x128xf32>
    %cst_40 = arith.constant dense<0.000000e+00> : vector<64x128xf32>
    %89 = tpu.matmul %70, %85, %cst_40 {dimension_numbers = #tpu.dot_dimension_numbers<[1], [0], [0], [1], [0, 0, 1, 1], [], []>} : vector<64x32xf32>, vector<32x128xf32>, vector<64x128xf32> -> vector<64x128xf32>
    %90 = arith.addf %88, %89 : vector<64x128xf32>
    %91 = vector.broadcast %4 : vector<64x1xf32> to vector<64x128xf32>
    %92 = arith.addf %90, %91 : vector<64x128xf32>
    %cst_41 = arith.constant dense<0.000000e+00> : vector<64xf32>
    %93 = vector.multi_reduction <add>, %81, %cst_41 [1] : vector<64x128xf32> to vector<64xf32>
    %94 = vector.shape_cast %93 : vector<64xf32> to vector<64x1xf32>
    %cst_42 = arith.constant dense<0.000000e+00> : vector<64xf32>
    %95 = vector.multi_reduction <add>, %92, %cst_42 [1] : vector<64x128xf32> to vector<64xf32>
    %96 = vector.shape_cast %95 : vector<64xf32> to vector<64x1xf32>
    %97 = tpu.concatenate %94, %96 in 1 : vector<64x1xf32>, vector<64x1xf32> -> vector<64x2xf32>
    %c0_43 = arith.constant 0 : index
    %c0_44 = arith.constant 0 : index
    %98 = vector.load %arg5[%c0_43, %c0_44] : memref<64x64xf32, #tpu.memory_space<vmem>>, vector<64x64xf32>
    %cst_45 = arith.constant dense<0.000000e+00> : vector<64x2xf32>
    %99 = tpu.matmul %98, %97, %cst_45 {dimension_numbers = #tpu.dot_dimension_numbers<[1], [0], [0], [1], [0, 0, 1, 1], [], []>} : vector<64x64xf32>, vector<64x2xf32>, vector<64x2xf32> -> vector<64x2xf32>
    %100 = vector.extract_strided_slice %99 {offsets = [0, 0], sizes = [64, 1], strides = [1, 1]} : vector<64x2xf32> to vector<64x1xf32>
    %101 = vector.broadcast %100 : vector<64x1xf32> to vector<64x128xf32>
    %102 = arith.subf %81, %101 : vector<64x128xf32>
    %103 = vector.extract_strided_slice %99 {offsets = [0, 1], sizes = [64, 1], strides = [1, 1]} : vector<64x2xf32> to vector<64x1xf32>
    %104 = vector.broadcast %103 : vector<64x1xf32> to vector<64x128xf32>
    %105 = arith.subf %92, %104 : vector<64x128xf32>
    %106 = arith.mulf %102, %102 : vector<64x128xf32>
    %cst_46 = arith.constant dense<0.000000e+00> : vector<64xf32>
    %107 = vector.multi_reduction <add>, %106, %cst_46 [1] : vector<64x128xf32> to vector<64xf32>
    %108 = vector.shape_cast %107 : vector<64xf32> to vector<64x1xf32>
    %109 = arith.mulf %105, %105 : vector<64x128xf32>
    %cst_47 = arith.constant dense<0.000000e+00> : vector<64xf32>
    %110 = vector.multi_reduction <add>, %109, %cst_47 [1] : vector<64x128xf32> to vector<64xf32>
    %111 = vector.shape_cast %110 : vector<64xf32> to vector<64x1xf32>
    %112 = tpu.concatenate %108, %111 in 1 : vector<64x1xf32>, vector<64x1xf32> -> vector<64x2xf32>
    %c0_48 = arith.constant 0 : index
    %c0_49 = arith.constant 0 : index
    %113 = vector.load %arg5[%c0_48, %c0_49] : memref<64x64xf32, #tpu.memory_space<vmem>>, vector<64x64xf32>
    %cst_50 = arith.constant dense<0.000000e+00> : vector<64x2xf32>
    %114 = tpu.matmul %113, %112, %cst_50 {dimension_numbers = #tpu.dot_dimension_numbers<[1], [0], [0], [1], [0, 0, 1, 1], [], []>} : vector<64x64xf32>, vector<64x2xf32>, vector<64x2xf32> -> vector<64x2xf32>
    %cst_51 = arith.constant 9.99999997E-7 : f32
    %115 = vector.broadcast %cst_51 : f32 to vector<64x2xf32>
    %116 = arith.addf %114, %115 : vector<64x2xf32>
    %117 = math.rsqrt %116 : vector<64x2xf32>
    %118 = vector.broadcast %2 : vector<64x1xf32> to vector<64x2xf32>
    %119 = arith.mulf %117, %118 : vector<64x2xf32>
    %120 = vector.extract_strided_slice %119 {offsets = [0, 0], sizes = [64, 1], strides = [1, 1]} : vector<64x2xf32> to vector<64x1xf32>
    %121 = vector.broadcast %120 : vector<64x1xf32> to vector<64x128xf32>
    %122 = arith.mulf %102, %121 : vector<64x128xf32>
    %123 = vector.broadcast %3 : vector<64x1xf32> to vector<64x128xf32>
    %124 = arith.addf %122, %123 : vector<64x128xf32>
    %125 = arith.negf %124 : vector<64x128xf32>
    %126 = math.exp %125 : vector<64x128xf32>
    %cst_52 = arith.constant 1.000000e+00 : f32
    %127 = vector.broadcast %cst_52 : f32 to vector<64x128xf32>
    %128 = arith.addf %127, %126 : vector<64x128xf32>
    %129 = arith.divf %127, %128 : vector<64x128xf32>
    %130 = arith.mulf %124, %129 : vector<64x128xf32>
    %131 = vector.extract_strided_slice %119 {offsets = [0, 1], sizes = [64, 1], strides = [1, 1]} : vector<64x2xf32> to vector<64x1xf32>
    %132 = vector.broadcast %131 : vector<64x1xf32> to vector<64x128xf32>
    %133 = arith.mulf %105, %132 : vector<64x128xf32>
    %134 = vector.broadcast %3 : vector<64x1xf32> to vector<64x128xf32>
    %135 = arith.addf %133, %134 : vector<64x128xf32>
    %136 = arith.negf %135 : vector<64x128xf32>
    %137 = math.exp %136 : vector<64x128xf32>
    %cst_53 = arith.constant 1.000000e+00 : f32
    %138 = vector.broadcast %cst_53 : f32 to vector<64x128xf32>
    %139 = arith.addf %138, %137 : vector<64x128xf32>
    %140 = arith.divf %138, %139 : vector<64x128xf32>
    %141 = arith.mulf %135, %140 : vector<64x128xf32>
    %c0_54 = arith.constant 0 : index
    %c0_55 = arith.constant 0 : index
    %142 = vector.load %arg8[%c0_54, %c0_55] : memref<64x32xf32, #tpu.memory_space<vmem>>, vector<64x32xf32>
    %143 = tpu.iota {dimensions = array<i32: 1>} : vector<64x128xi32>
    %c0_i32_56 = arith.constant 0 : i32
    %144 = vector.broadcast %c0_i32_56 : i32 to vector<64x128xi32>
    %145 = arith.cmpi eq, %143, %144 : vector<64x128xi32>
    %c127_i32_57 = arith.constant 127 : i32
    %146 = vector.broadcast %c127_i32_57 : i32 to vector<64x128xi32>
    %147 = arith.cmpi eq, %143, %146 : vector<64x128xi32>
    %cst_58 = arith.constant 0.000000e+00 : f32
    %148 = vector.broadcast %cst_58 : f32 to vector<64x128xf32>
    %c0_59 = arith.constant 0 : index
    %c0_60 = arith.constant 0 : index
    %c0_61 = arith.constant 0 : index
    %149 = vector.load %arg7[%c0_59, %c0_60, %c0_61] : memref<3x64x64xf32, #tpu.memory_space<vmem>>, vector<1x64x64xf32>
    %150 = vector.shape_cast %149 : vector<1x64x64xf32> to vector<64x64xf32>
    %c1_62 = arith.constant 1 : index
    %c0_63 = arith.constant 0 : index
    %c0_64 = arith.constant 0 : index
    %151 = vector.load %arg7[%c1_62, %c0_63, %c0_64] : memref<3x64x64xf32, #tpu.memory_space<vmem>>, vector<1x64x64xf32>
    %152 = vector.shape_cast %151 : vector<1x64x64xf32> to vector<64x64xf32>
    %c2_65 = arith.constant 2 : index
    %c0_66 = arith.constant 0 : index
    %c0_67 = arith.constant 0 : index
    %153 = vector.load %arg7[%c2_65, %c0_66, %c0_67] : memref<3x64x64xf32, #tpu.memory_space<vmem>>, vector<1x64x64xf32>
    %154 = vector.shape_cast %153 : vector<1x64x64xf32> to vector<64x64xf32>
    %c1_i32_68 = arith.constant 1 : i32
    %155 = tpu.dynamic_rotate %130 by %c1_i32_68 dim 1 : vector<64x128xf32>, i32 -> vector<64x128xf32>
    %156 = arith.select %145, %148, %155 : vector<64x128xi1>, vector<64x128xf32>
    %c127_i32_69 = arith.constant 127 : i32
    %157 = tpu.dynamic_rotate %130 by %c127_i32_69 dim 1 : vector<64x128xf32>, i32 -> vector<64x128xf32>
    %158 = arith.select %147, %148, %157 : vector<64x128xi1>, vector<64x128xf32>
    %cst_70 = arith.constant dense<0.000000e+00> : vector<64x128xf32>
    %159 = tpu.matmul %152, %130, %cst_70 {dimension_numbers = #tpu.dot_dimension_numbers<[1], [0], [0], [1], [0, 0, 1, 1], [], []>} : vector<64x64xf32>, vector<64x128xf32>, vector<64x128xf32> -> vector<64x128xf32>
    %cst_71 = arith.constant dense<0.000000e+00> : vector<64x128xf32>
    %160 = tpu.matmul %150, %156, %cst_71 {dimension_numbers = #tpu.dot_dimension_numbers<[1], [0], [0], [1], [0, 0, 1, 1], [], []>} : vector<64x64xf32>, vector<64x128xf32>, vector<64x128xf32> -> vector<64x128xf32>
    %161 = arith.addf %159, %160 : vector<64x128xf32>
    %cst_72 = arith.constant dense<0.000000e+00> : vector<64x128xf32>
    %162 = tpu.matmul %154, %158, %cst_72 {dimension_numbers = #tpu.dot_dimension_numbers<[1], [0], [0], [1], [0, 0, 1, 1], [], []>} : vector<64x64xf32>, vector<64x128xf32>, vector<64x128xf32> -> vector<64x128xf32>
    %163 = arith.addf %161, %162 : vector<64x128xf32>
    %cst_73 = arith.constant dense<0.000000e+00> : vector<64x128xf32>
    %164 = tpu.matmul %142, %7, %cst_73 {dimension_numbers = #tpu.dot_dimension_numbers<[1], [0], [0], [1], [0, 0, 1, 1], [], []>} : vector<64x32xf32>, vector<32x128xf32>, vector<64x128xf32> -> vector<64x128xf32>
    %165 = arith.addf %163, %164 : vector<64x128xf32>
    %166 = vector.broadcast %5 : vector<64x1xf32> to vector<64x128xf32>
    %167 = arith.addf %165, %166 : vector<64x128xf32>
    %c1_i32_74 = arith.constant 1 : i32
    %168 = tpu.dynamic_rotate %141 by %c1_i32_74 dim 1 : vector<64x128xf32>, i32 -> vector<64x128xf32>
    %169 = arith.select %145, %148, %168 : vector<64x128xi1>, vector<64x128xf32>
    %c127_i32_75 = arith.constant 127 : i32
    %170 = tpu.dynamic_rotate %141 by %c127_i32_75 dim 1 : vector<64x128xf32>, i32 -> vector<64x128xf32>
    %171 = arith.select %147, %148, %170 : vector<64x128xi1>, vector<64x128xf32>
    %cst_76 = arith.constant dense<0.000000e+00> : vector<64x128xf32>
    %172 = tpu.matmul %152, %141, %cst_76 {dimension_numbers = #tpu.dot_dimension_numbers<[1], [0], [0], [1], [0, 0, 1, 1], [], []>} : vector<64x64xf32>, vector<64x128xf32>, vector<64x128xf32> -> vector<64x128xf32>
    %cst_77 = arith.constant dense<0.000000e+00> : vector<64x128xf32>
    %173 = tpu.matmul %150, %169, %cst_77 {dimension_numbers = #tpu.dot_dimension_numbers<[1], [0], [0], [1], [0, 0, 1, 1], [], []>} : vector<64x64xf32>, vector<64x128xf32>, vector<64x128xf32> -> vector<64x128xf32>
    %174 = arith.addf %172, %173 : vector<64x128xf32>
    %cst_78 = arith.constant dense<0.000000e+00> : vector<64x128xf32>
    %175 = tpu.matmul %154, %171, %cst_78 {dimension_numbers = #tpu.dot_dimension_numbers<[1], [0], [0], [1], [0, 0, 1, 1], [], []>} : vector<64x64xf32>, vector<64x128xf32>, vector<64x128xf32> -> vector<64x128xf32>
    %176 = arith.addf %174, %175 : vector<64x128xf32>
    %cst_79 = arith.constant dense<0.000000e+00> : vector<64x128xf32>
    %177 = tpu.matmul %142, %9, %cst_79 {dimension_numbers = #tpu.dot_dimension_numbers<[1], [0], [0], [1], [0, 0, 1, 1], [], []>} : vector<64x32xf32>, vector<32x128xf32>, vector<64x128xf32> -> vector<64x128xf32>
    %178 = arith.addf %176, %177 : vector<64x128xf32>
    %179 = vector.broadcast %5 : vector<64x1xf32> to vector<64x128xf32>
    %180 = arith.addf %178, %179 : vector<64x128xf32>
    %c0_80 = arith.constant 0 : index
    %c0_81 = arith.constant 0 : index
    %c0_82 = arith.constant 0 : index
    %181 = vector.load %arg9[%c0_80, %c0_81, %c0_82] : memref<2x64x128xf32, #tpu.memory_space<vmem>>, vector<1x64x128xf32>
    %182 = vector.shape_cast %181 : vector<1x64x128xf32> to vector<64x128xf32>
    %183 = vector.shape_cast %167 : vector<64x128xf32> to vector<1x64x128xf32>
    tpu.vector_store %arg9[%c0_80, %c0_81, %c0_82], %183 {strides = array<i32>} : memref<2x64x128xf32, #tpu.memory_space<vmem>>, vector<1x64x128xf32>,
    %c1_83 = arith.constant 1 : index
    %c0_84 = arith.constant 0 : index
    %c0_85 = arith.constant 0 : index
    %184 = vector.load %arg9[%c1_83, %c0_84, %c0_85] : memref<2x64x128xf32, #tpu.memory_space<vmem>>, vector<1x64x128xf32>
    %185 = vector.shape_cast %184 : vector<1x64x128xf32> to vector<64x128xf32>
    %186 = vector.shape_cast %180 : vector<64x128xf32> to vector<1x64x128xf32>
    tpu.vector_store %arg9[%c1_83, %c0_84, %c0_85], %186 {strides = array<i32>} : memref<2x64x128xf32, #tpu.memory_space<vmem>>, vector<1x64x128xf32>,
    return
  }
  func.func @transform_0(%arg0: i32) -> (i32, i32, i32) {
    %c0_i32 = arith.constant 0 : i32
    %c0_i32_0 = arith.constant 0 : i32
    %c0_i32_1 = arith.constant 0 : i32
    return %arg0, %c0_i32, %c0_i32_0 : i32, i32, i32
  }
  func.func @transform_1(%arg0: i32) -> (i32, i32) {
    %c0_i32 = arith.constant 0 : i32
    %c0_i32_0 = arith.constant 0 : i32
    %c0_i32_1 = arith.constant 0 : i32
    return %c0_i32, %c0_i32_0 : i32, i32
  }
  func.func @transform_2(%arg0: i32) -> (i32, i32) {
    %c0_i32 = arith.constant 0 : i32
    %c0_i32_0 = arith.constant 0 : i32
    %c0_i32_1 = arith.constant 0 : i32
    return %c0_i32, %c0_i32_0 : i32, i32
  }
  func.func @transform_3(%arg0: i32) -> (i32, i32) {
    %c0_i32 = arith.constant 0 : i32
    %c0_i32_0 = arith.constant 0 : i32
    %c0_i32_1 = arith.constant 0 : i32
    return %c0_i32, %c0_i32_0 : i32, i32
  }
  func.func @transform_4(%arg0: i32) -> (i32, i32) {
    %c0_i32 = arith.constant 0 : i32
    %c0_i32_0 = arith.constant 0 : i32
    %c0_i32_1 = arith.constant 0 : i32
    return %c0_i32, %c0_i32_0 : i32, i32
  }
  func.func @transform_5(%arg0: i32) -> (i32, i32, i32) {
    %c0_i32 = arith.constant 0 : i32
    %c0_i32_0 = arith.constant 0 : i32
    %c0_i32_1 = arith.constant 0 : i32
    %c0_i32_2 = arith.constant 0 : i32
    return %c0_i32, %c0_i32_0, %c0_i32_1 : i32, i32, i32
  }
  func.func @transform_6(%arg0: i32) -> (i32, i32, i32) {
    %c0_i32 = arith.constant 0 : i32
    %c0_i32_0 = arith.constant 0 : i32
    %c0_i32_1 = arith.constant 0 : i32
    %c0_i32_2 = arith.constant 0 : i32
    return %c0_i32, %c0_i32_0, %c0_i32_1 : i32, i32, i32
  }
  func.func @transform_7(%arg0: i32) -> (i32, i32) {
    %c0_i32 = arith.constant 0 : i32
    %c0_i32_0 = arith.constant 0 : i32
    %c0_i32_1 = arith.constant 0 : i32
    return %c0_i32, %c0_i32_0 : i32, i32
  }
  func.func @transform_8(%arg0: i32) -> (i32, i32, i32) {
    %c0_i32 = arith.constant 0 : i32
    %c0_i32_0 = arith.constant 0 : i32
    %c0_i32_1 = arith.constant 0 : i32
    return %arg0, %c0_i32, %c0_i32_0 : i32, i32, i32
  }
}

</mosaic_0001>

<bundles_post_ra>
// kernel: tpu_custom_call.1
= control target key start
LH: loop header
LB: loop body
LE: loop exit
PB: predicated region body
PF: predicated region fallthrough
CT: control target
= control target key end

     0   :  { %13 = vsyncpa [#allocation3], 0  ;;  %s6340_s0 = inlined_call_operand.vmem [shape: f32[8,32,128], index: 0, kind: input, shape index: {}]   ;;  %s6341_s1 = inlined_call_operand.vmem [shape: f32[32,2], index: 1, kind: input, shape index: {}]   ;;  %s6342_s2 = inlined_call_operand.vmem [shape: f32[64,4], index: 2, kind: input, shape index: {}]   ;;  %s6343_s3 = inlined_call_operand.hbm [shape: f32[32,32], index: 3, kind: input, shape index: {}]   ;;  %s6344_s4 = inlined_call_operand.hbm [shape: f32[64,64], index: 4, kind: input, shape index: {}]   ;;  %s6345_s5 = inlined_call_operand.vmem [shape: f32[3,64,32], index: 5, kind: input, shape index: {}]   ;;  %s6346_s6 = inlined_call_operand.vmem [shape: f32[3,64,64], index: 6, kind: input, shape index: {}]   ;;  %s6347_s7 = inlined_call_operand.vmem [shape: f32[64,32], index: 7, kind: input, shape index: {}]   ;;  %s6348_s8 = inlined_call_operand.hbm [shape: f32[8,64,128], index: 8, kind: output, shape index: {}]  }
   0x1   :  { %14 = vsyncpa [#allocation6], 0 }
   0x2   :  { %15 = vsyncpa [#allocation4], 0 }
   0x3   :  { %17 = vsyncpa [#allocation4 + $0x1], 0  ;;  %s4796_s27 = smov 0   ;;  %s4798_s28 = smov 0  }
   0x4   :  { %s4800_s29 = smov 0   ;;  %s4802_s30 = smov 0  }
   0x5 LB: > { %s4817_s9 = sadd.s32 4294967295, %s4736_s30   ;;  %s3456_s10 = sadd.s32 4294967294, %s4736_s30   ;;  %s4736_s30 = sphi %s4802_s30, %s6362_s30   ;;  %s4732_s29 = sphi %s4800_s29, %s6361_s29   ;;  %s4728_s28 = sphi %s4798_s28, %s6360_s28   ;;  %s4724_s27 = sphi %s4796_s27, %s6359_s27  }
   0x6   : > { %s4821_s11 = sadd.s32 1, %s4736_s30   ;;  %s203_s12 = sadd.s32 1, %s4732_s29 }
   0x7   : > { %s200_s13 = ssub.s32 %s4736_s30, %s4821_s11  ;;  %p213_p0 = scmp.ne.s32.totalorder %s4732_s29, %s4728_s28 }
   0x8   : > { %p201_p1 = scmp.eq.s32.totalorder %s200_s13, 0  ;;  %p214_p2 = scmp.eq.s32.totalorder %s4817_s9, 3 }
   0x9   : > { %p219_p3 = scmp.ne.s32.totalorder %s4728_s28, %s4724_s27  ;;  %p220_p4 = scmp.eq.s32.totalorder %s3456_s10, 3 }
   0xa   : > { %s4832_s14 = scalar_select %p201_p1, %s4732_s29, %s203_s12  }
   0xb   : > { %p4834_p5 = por %p214_p2, %p213_p0  ;;  %p4838_p6 = por %p220_p4, %p219_p3 }
   0xc   : > { %p3457_p7 = scmp.ge.s32.totalorder %s4736_s30, 1  ;;  %p227_p8 = scmp.lt.s32.totalorder %s4736_s30, 5 }
   0xd   : > { %s6351_s16 = scalar_select %p4838_p6, 1, 0 }
   0xe   : > { %p6349_p9 = scmp.eq.s32.totalorder %s4817_s9, 0  ;;  %p4845_p10 = pnand %p3457_p7, %p227_p8 }
   0xf   : > { %s4738_s18 = smov [#allocation2]   ;;  %s4739_s21 = smov [#allocation5]  }
  0x10   : > { %s245_s19 = sshll.u32 %s4738_s18, 4  ;;  %p4389_p11 = pneg %p4845_p10  ;;  %s246_s19 = int_to_ptr.vmem [resolvable:$true] %s245_s19 }
  0x11   : > { %s258_s22 = sshll.u32 %s4739_s21, 4  ;;  %s4627_s23 = scalar_lea.vmem %s246_s19, 512  ;;  %s259_s22 = int_to_ptr.vmem [resolvable:$true] %s258_s22 }
  0x12   : > { %p4853_p12 = pnand %p6349_p9, %p4389_p11  ;;  %p4628_p0 = scmp.ne.s32.totalorder %s246_s19, %s4627_s23 }
  0x13   : > { %p4635_p3 = scmp.lt.s32.totalorder %s246_s19, %s246_s19  ;;  %p4636_p4 = scmp.lt.s32.totalorder %s4627_s23, %s4627_s23 }
  0x14   : > { %p4618_p13 = pneg %p4853_p12 }
  0x15   : > { %p4637_p7 = por %p4636_p4, %p4635_p3 }
  0x16   : > { %p4630_p1 = pnand %p4628_p0, %p4618_p13 }
  0x18   : > { %p4631_p2 = pneg %p4630_p1 }
  0x1a   : > { %p4638_p8 = pnand %p4637_p7, %p4631_p2 }
  0x1c   : > { %4641 = shalt.err (!%p4638_p8)
}
  0x1d   : > { %s4740_s24 = smov 128   ;;  %s4741_s25 = smov 8  }
  0x1e   : > { %4392 = dma.hbm_to_vmem [thread:$0]  (!%p4853_p12), %s6343_s3, 512, %s246_s19, [#allocation3], %s4740_s24, %s4740_s24, %s4741_s25  }
  0x1f   : > { %s4653_s12 = scalar_lea.vmem %s259_s22, 1024  ;;  %p4661_p9 = scmp.lt.s32.totalorder %s259_s22, %s259_s22 }
  0x20   : > { %p4654_p11 = scmp.ne.s32.totalorder %s259_s22, %s4653_s12  ;;  %p4662_p6 = scmp.lt.s32.totalorder %s4653_s12, %s4653_s12 }
  0x22   : > { %p4656_p0 = pnand %p4654_p11, %p4618_p13  ;;  %p4663_p3 = por %p4662_p6, %p4661_p9 }
  0x24   : > { %p4657_p1 = pneg %p4656_p0 }
  0x26   : > { %p4664_p2 = pnand %p4663_p3, %p4657_p1 }
  0x28   : > { %4667 = shalt.err (!%p4664_p2)
}
  0x29   : > { %4395 = dma.hbm_to_vmem [thread:$0]  (!%p4853_p12), %s6344_s4, 1024, %s259_s22, [#allocation6], %s4740_s24, %s4740_s24, %s4741_s25  }
  0x2a   : > { %293 = sbr.rel (%p4845_p10) target bundleno = 2522 (0x9da), region = 52  ;;  %p6354_p4 = scmp.eq.s32.totalorder (!%p4845_p10), %s4817_s9, 0 }
  0x2f   : > { %4711 = dma.done.wait (%p6354_p4), [#allocation3], 512   ;;  %p6355_p13 = pmov %p6354_p4 }
  0x30   : > { %p6356_p7 = pmov %p6354_p4 }
  0x31   : > { %4713 = vsyncadd (%p6355_p13), [#allocation3], 4294966784 }
  0x32   : > { %4715 = dma.done.wait (%p6356_p7), [#allocation6], 1024   ;;  %p6357_p6 = pmov %p6354_p4 }
  0x33   : > { %s3465_s19 = sshll.u32 %s4817_s9, 1  ;;  %v4742_v8 = vmov 1   ;;  %v4743_v9 = vmov 0   ;;  %vm377_vm0 = vcmask 7168   ;;  %v343_v17 = vld [vmem:[%s6341_s1 + $0x18] sm:$0xff]  ;;  %v4935_v27 = vld [vmem:[%s6341_s1 + $0x10] sm:$0xff] }
  0x34   : > { %4717 = vsyncadd (%p6357_p6), [#allocation6], 4294966272  ;;  %p333_p9 = scmp.lt.s32.totalorder %s3465_s19, 7  ;;  %4450 = vset.pattern.permute.xlu1 %v4742_v8  ;;  %4449 = vset.pattern.permute.xlu0 %v4743_v9  ;;  %v341_v52 = vld [vmem:[%s6341_s1 + $0x8] sm:$0xff]  ;;  %v340_v53 = vld [vmem:[%s6341_s1] sm:$0xff]  ;;  %vm672_vm1 = vcmask 261120  }
  0x35   : > { %s4745_s24 = smov 127   ;;  %vm1519_vm4 = vcmask 523264   ;;  %s3768_s26 = sshll.u32 %s4817_s9, 11 }
  0x36   : > { %s6364_s19 = smov (!%p333_p9, %s3465_s19), 7  ;;  %s6291_s18 = scalar_lea.hbm %s6348_s8, %s3768_s26 }
  0x37   : > { %s3766_s20 = sshll.u32 %s6364_s19, 5  ;;  %s4744_s19 = smov 1  }
  0x38   : > { %s4889_s22 = scalar_lea.vmem %s6340_s0, %s3766_s20  ;;  %s4748_s21 = smov [#allocation7]  }
  0x39   : > { %v355_v0 = vld [vmem:[%s4889_s22 + $0x18] sm:$0xff]  ;;  %v4893_v1 = vld [vmem:[%s4889_s22 + $0x10] sm:$0xff]  ;;  %v4902_v4 = vld [vmem:[%s4889_s22 + $0x28] sm:$0xff]  ;;  %s4672_s17 = sshll.u32 %s4748_s21, 4  ;;  %s4673_s17 = int_to_ptr.vmem [resolvable:$false] %s4672_s17 }
  0x3a   : > { %367 = vadd.xlane.f32.xlu0 %v355_v0  ;;  %365 = vadd.xlane.f32.xlu1 %v4893_v1  ;;  %v3471_v2 = vld [vmem:[%s4889_s22 + $0x38] sm:$0xff]  ;;  %v4898_v3 = vld [vmem:[%s4889_s22 + $0x30] sm:$0xff]  ;;  %v4905_v5 = vld [vmem:[%s4889_s22 + $0x8] sm:$0xff]  ;;  %s4674_s23 = scalar_lea.vmem %s4673_s17, 4096 }
  0x3b   : > { %v4910_v6 = vld [vmem:[%s4889_s22 + $0x20] sm:$0xff] }
  0x3c   : > { %v4913_v7 = vld [vmem:[%s4889_s22] sm:$0xff] }
  0x3e   : > { %375 = vadd.xlane.f32.xlu0 %v3471_v2  ;;  %373 = vadd.xlane.f32.xlu1 %v4898_v3 }
  0x42   : > { %371 = vadd.xlane.f32.xlu1 %v4902_v4  ;;  %363 = vadd.xlane.f32.xlu0 %v4905_v5 }
  0x46   : > { %369 = vadd.xlane.f32.xlu1 %v4910_v6  ;;  %361 = vadd.xlane.f32.xlu0 %v4913_v7 }
  0xc3   : > { %v368_v10 = vpop.xlane.xlu0 %367  ;;  %v366_v11 = vpop.xlane.xlu1 %365 }
  0xc7   : > { %v376_v12 = vpop.xlane.xlu0 %375  ;;  %v374_v14 = vpop.xlane.xlu1 %373 }
  0xc8   : > { %v381_v13 = vsel %vm377_vm0, %v368_v10, %v376_v12  ;;  %v380_v16 = vsel %vm377_vm0, %v366_v11, %v374_v14 }
  0xc9   : > { %v385_v15 = vmul.f32 0.0078125, %v381_v13  ;;  %v384_v18 = vmul.f32 0.0078125, %v380_v16 }
  0xcb   : > { %423 = vperm.xlu1 %4450, %v385_v15   ;;  %403 = vperm.xlu0 %4449, %v385_v15   ;;  %v372_v19 = vpop.xlane.xlu1 %371  ;;  %v364_v20 = vpop.xlane.xlu0 %363 }
  0xcc   : > { %v379_v21 = vsel %vm377_vm0, %v364_v20, %v372_v19 }
  0xcd   : > { %v383_v22 = vmul.f32 0.0078125, %v379_v21 }
  0xcf   : > { %4451 = vset.pattern.permute.xlu1 %v4743_v9  ;;  %487 = vperm.xlu0 %4449, %v343_v17   ;;  %v370_v23 = vpop.xlane.xlu1 %369  ;;  %v362_v24 = vpop.xlane.xlu0 %361 }
  0xd0   : > { %398 = vperm.xlu1 %4451, %v384_v18   ;;  %v378_v25 = vsel %vm377_vm0, %v362_v24, %v370_v23 }
  0xd1   : > { %v382_v26 = vmul.f32 0.0078125, %v378_v25 }
  0xd4   : > { %4452 = vset.pattern.permute.xlu1 %v4742_v8 }
  0xd5   : > { %419 = vperm.xlu1 %4452, %v384_v18  }
  0xd9   : > { %4453 = vset.pattern.permute.xlu1 %v4743_v9 }
  0xda   : > { %393 = vperm.xlu1 %4453, %v383_v22  }
  0xde   : > { %4454 = vset.pattern.permute.xlu1 %v4742_v8 }
  0xdf   : > { %415 = vperm.xlu1 %4454, %v383_v22  }
  0xe3   : > { %4455 = vset.pattern.permute.xlu1 %v4743_v9 }
  0xe4   : > { %388 = vperm.xlu1 %4455, %v382_v26  }
  0xe8   : > { %4456 = vset.pattern.permute.xlu1 %v4742_v8 }
  0xe9   : > { %411 = vperm.xlu1 %4456, %v382_v26  }
  0xed   : > { %4457 = vset.pattern.permute.xlu1 %v4743_v9 }
  0xee   : > { %482 = vperm.xlu1 %4457, %v4935_v27  }
 0x146   : > { %v424_v28 = vpop.permute.xlu1 %423  ;;  %v404_v29 = vpop.permute.xlu0 %403 }
 0x147   : > { %v4939_v30 = vsub.f32 %v3471_v2, %v424_v28  ;;  %v4941_v31 = vsub.f32 %v355_v0, %v404_v29 }
 0x149   : > { %v445_v32 = vmul.f32 %v4939_v30, %v4939_v30  ;;  %v433_v33 = vmul.f32 %v4941_v31, %v4941_v31 }
 0x14a   : > { %v488_v54 = vpop.permute.xlu0 %487 }
 0x14b   : > { %v399_v34 = vpop.permute.xlu1 %398  ;;  %452 = vadd.xlane.f32.xlu0 %v445_v32  ;;  %440 = vadd.xlane.f32.xlu1 %v433_v33 }
 0x14c   : > { %v4948_v35 = vsub.f32 %v4893_v1, %v399_v34 }
 0x14e   : > { %v432_v36 = vmul.f32 %v4948_v35, %v4948_v35 }
 0x150   : > { %v420_v37 = vpop.permute.xlu1 %419  ;;  %438 = vadd.xlane.f32.xlu0 %v432_v36 }
 0x151   : > { %v4953_v38 = vsub.f32 %v4898_v3, %v420_v37 }
 0x153   : > { %v444_v39 = vmul.f32 %v4953_v38, %v4953_v38 }
 0x155   : > { %v394_v40 = vpop.permute.xlu1 %393  ;;  %450 = vadd.xlane.f32.xlu1 %v444_v39 }
 0x156   : > { %v4958_v41 = vsub.f32 %v4905_v5, %v394_v40 }
 0x158   : > { %v431_v42 = vmul.f32 %v4958_v41, %v4958_v41 }
 0x15a   : > { %v416_v43 = vpop.permute.xlu1 %415  ;;  %436 = vadd.xlane.f32.xlu0 %v431_v42 }
 0x15b   : > { %v4963_v44 = vsub.f32 %v4902_v4, %v416_v43 }
 0x15d   : > { %v443_v45 = vmul.f32 %v4963_v44, %v4963_v44 }
 0x15f   : > { %v389_v46 = vpop.permute.xlu1 %388  ;;  %448 = vadd.xlane.f32.xlu1 %v443_v45 }
 0x160   : > { %v4968_v47 = vsub.f32 %v4913_v7, %v389_v46 }
 0x162   : > { %v430_v48 = vmul.f32 %v4968_v47, %v4968_v47 }
 0x164   : > { %v412_v49 = vpop.permute.xlu1 %411  ;;  %434 = vadd.xlane.f32.xlu0 %v430_v48 }
 0x165   : > { %v4973_v50 = vsub.f32 %v4910_v6, %v412_v49 }
 0x167   : > { %v442_v51 = vmul.f32 %v4973_v50, %v4973_v50 }
 0x169   : > { %446 = vadd.xlane.f32.xlu1 %v442_v51  ;;  %v483_v55 = vpop.permute.xlu1 %482 }
 0x17a   : > { %477 = vperm.xlu1 %4457, %v341_v52   ;;  %472 = vperm.xlu0 %4449, %v340_v53  }
 0x17e   : > { %4458 = vset.pattern.permute.xlu1 %v4742_v8 }
 0x17f   : > { %531 = vperm.xlu1 %4458, %v343_v17  }
 0x183   : > { %4459 = vset.pattern.permute.xlu1 %v4743_v9 }
 0x1d4   : > { %v453_v56 = vpop.xlane.xlu0 %452  ;;  %v441_v57 = vpop.xlane.xlu1 %440 }
 0x1d5   : > { %v457_v58 = vsel %vm377_vm0, %v441_v57, %v453_v56 }
 0x1d6   : > { %v461_v59 = vmul.f32 0.0078125, %v457_v58 }
 0x1d8   : > { %v465_v60 = vadd.f32 1e-06, %v461_v59 }
 0x1d9   : > { %v439_v61 = vpop.xlane.xlu0 %438 }
 0x1da   : > { %4480 = vrsqrt.f32 %v465_v60 }
 0x1de   : > { %v451_v62 = vpop.xlane.xlu1 %450 }
 0x1df   : > { %v456_v63 = vsel %vm377_vm0, %v439_v61, %v451_v62 }
 0x1e0   : > { %v460_v0 = vmul.f32 0.0078125, %v456_v63 }
 0x1e2   : > { %v464_v1 = vadd.f32 1e-06, %v460_v0 }
 0x1e3   : > { %v437_v3 = vpop.xlane.xlu0 %436 }
 0x1e4   : > { %4482 = vrsqrt.f32 %v464_v1 }
 0x1e7   : > { %v4481_v2 = vpop.eup %4480 }
 0x1e8   : > { %v449_v4 = vpop.xlane.xlu1 %448  ;;  %v493_v5 = vmul.f32 %v4481_v2, %v488_v54 }
 0x1e9   : > { %v455_v6 = vsel %vm377_vm0, %v437_v3, %v449_v4 }
 0x1ea   : > { %v459_v7 = vmul.f32 0.0078125, %v455_v6  ;;  %511 = vperm.xlu1 %4459, %v493_v5  }
 0x1ec   : > { %v463_v10 = vadd.f32 1e-06, %v459_v7 }
 0x1ed   : > { %v435_v12 = vpop.xlane.xlu0 %434 }
 0x1ee   : > { %4484 = vrsqrt.f32 %v463_v10  ;;  %4460 = vset.pattern.permute.xlu1 %v4742_v8 }
 0x1ef   : > { %527 = vperm.xlu1 %4460, %v4935_v27  }
 0x1f1   : > { %v4483_v11 = vpop.eup %4482 }
 0x1f2   : > { %v447_v13 = vpop.xlane.xlu1 %446  ;;  %v492_v14 = vmul.f32 %v4483_v11, %v483_v55 }
 0x1f3   : > { %v454_v15 = vsel %vm377_vm0, %v435_v12, %v447_v13  ;;  %523 = vperm.xlu1 %4460, %v341_v52  }
 0x1f4   : > { %v458_v16 = vmul.f32 0.0078125, %v454_v15  ;;  %506 = vperm.xlu0 %4449, %v492_v14  }
 0x1f5   : > { %v473_v22 = vpop.permute.xlu0 %472 }
 0x1f6   : > { %v462_v17 = vadd.f32 1e-06, %v458_v16  ;;  %v478_v19 = vpop.permute.xlu1 %477 }
 0x1f7   : > { %579 = vperm.xlu1 %4460, %v493_v5  }
 0x1f8   : > { %4486 = vrsqrt.f32 %v462_v17 }
 0x1fa   : > { %v532_v24 = vpop.permute.xlu1 %531 }
 0x1fb   : > { %v4485_v18 = vpop.eup %4484  ;;  %575 = vperm.xlu1 %4460, %v492_v14  }
 0x1fc   : > { %v491_v20 = vmul.f32 %v4485_v18, %v478_v19  ;;  %v622_v19 = vld [vmem:[%s6345_s5] sm:$0xff] }
 0x1fd   : > { %4003 = vmatprep.mubr.msk.f32.mxu0 %vm672_vm1, %v622_v19 }
 0x1fe   : > { %501 = vperm.xlu0 %4449, %v491_v20  }
 0x205   : > { %v4487_v21 = vpop.eup %4486 }
 0x206   : > { %v490_v23 = vmul.f32 %v4487_v21, %v473_v22 }
 0x208   : > { %567 = vperm.xlu1 %4460, %v490_v23   ;;  %496 = vperm.xlu0 %4449, %v490_v23  }
 0x20c   : > { %4461 = vset.pattern.permute.xlu0 %v4742_v8 }
 0x20d   : > { %519 = vperm.xlu0 %4461, %v340_v53  }
 0x211   : > { %571 = vperm.xlu0 %4461, %v491_v20  }
 0x265   : > { %v512_v25 = vpop.permute.xlu1 %511 }
 0x266   : > { %v517_v26 = vmul.f32 %v512_v25, %v4941_v31 }
 0x268   : > { %v537_v27 = vadd.f32 %v532_v24, %v517_v26 }
 0x26a   : > { %v3475_v28 = vmul.f32 -1.442695, %v537_v27  ;;  %v528_v29 = vpop.permute.xlu1 %527 }
 0x26c   : > { %4488 = vpow2.f32 %v3475_v28  ;;  %v5037_v28 = vld [vmem:[%s6345_s5 + $0x48] sm:$0xff] }
 0x26e   : > { %v524_v32 = vpop.permute.xlu1 %523 }
 0x26f   : > { %v507_v33 = vpop.permute.xlu0 %506 }
 0x270   : > { %v516_v34 = vmul.f32 %v507_v33, %v4948_v35 }
 0x272   : > { %v536_v36 = vadd.f32 %v528_v29, %v516_v34  ;;  %v580_v37 = vpop.permute.xlu1 %579  ;;  %v5054_v34 = vld [vmem:[%s6345_s5 + $0x58] sm:$0xff] }
 0x273   : > { %v585_v40 = vmul.f32 %v580_v37, %v4939_v30  ;;  %v5071_v37 = vld [vmem:[%s6345_s5 + $0x68] sm:$0xff] }
 0x274   : > { %v3474_v39 = vmul.f32 -1.442695, %v536_v36 }
 0x275   : > { %v4996_v48 = vadd.f32 %v585_v40, %v532_v24 }
 0x276   : > { %4490 = vpow2.f32 %v3474_v39  ;;  %v576_v42 = vpop.permute.xlu1 %575  ;;  %v5077_v39 = vld [vmem:[%s6345_s5 + $0x70] sm:$0xff] }
 0x277   : > { %v584_v45 = vmul.f32 %v576_v42, %v4953_v38  ;;  %v3479_v35 = vmul.f32 -1.442695, %v4996_v48  ;;  %v5088_v42 = vld [vmem:[%s6345_s5 + $0x78] sm:$0xff] }
 0x279   : > { %v4489_v43 = vpop.eup %4488  ;;  %v502_v46 = vpop.permute.xlu0 %501  ;;  %v4999_v52 = vadd.f32 %v584_v45, %v528_v29  ;;  %v5043_v29 = vld [vmem:[%s6345_s5 + $0x50] sm:$0xff] }
 0x27a   : > { %v553_v31 = vadd.f32 1.0, %v4489_v43  ;;  %v515_v49 = vmul.f32 %v502_v46, %v4958_v41  ;;  %v5108_v45 = vld [vmem:[%s6342_s2 + $0x30] sm:$0xff]  ;;  %v5113_v46 = vld [vmem:[%s6342_s2 + $0x38] sm:$0xff] }
 0x27b   : > { %v3478_v30 = vmul.f32 -1.442695, %v4999_v52 }
 0x27c   : > { %4492 = vrcp.f32 %v553_v31  ;;  %v535_v51 = vadd.f32 %v524_v32, %v515_v49  ;;  %v4746_v31 = vmov 2   ;;  %v5125_v49 = vld [vmem:[%s6342_s2 + $0x20] sm:$0xff] }
 0x27d   : > { %4463 = vset.pattern.permute.xlu1 %v4746_v31  ;;  %4462 = vset.pattern.permute.xlu0 %v4746_v31 }
 0x27e   : > { %v3473_v53 = vmul.f32 -1.442695, %v535_v51 }
 0x280   : > { %4494 = vpow2.f32 %v3473_v53  ;;  %v5149_v53 = vld [vmem:[%s6342_s2] sm:$0xff] }
 0x281   : > { %4496 = vpow2.f32 %v3479_v35  ;;  %v5144_v35 = vld [vmem:[%s6342_s2 + $0x8] sm:$0xff] }
 0x282   : > { %4498 = vpow2.f32 %v3478_v30  ;;  %v618_v30 = vlaneseq }
 0x283   : > { %v4491_v54 = vpop.eup %4490  ;;  %v497_v55 = vpop.permute.xlu0 %496 }
 0x284   : > { %v552_v38 = vadd.f32 1.0, %v4491_v54  ;;  %v514_v56 = vmul.f32 %v497_v55, %v4968_v47  ;;  %v568_v60 = vpop.permute.xlu1 %567  ;;  %v5155_v54 = vand.u32 127, %v618_v30 }
 0x285   : > { %v582_v2 = vmul.f32 %v568_v60, %v4973_v50  ;;  %v5014_v50 = vld [vmem:[%s6345_s5 + $0x40] sm:$0xff]  ;;  %v623_v60 = vld [vmem:[%s6345_s5 + $0x8] sm:$0xff] }
 0x286   : > { %4500 = vrcp.f32 %v552_v38  ;;  %4023 = vmatprep.mubr.msk.f32.mxu1 %vm672_vm1, %v5014_v50  ;;  %vm3769_vm2 = vcmp.ne.s32.totalorder %v5155_v54, 0  ;;  %vm3770_vm3 = vcmp.ne.s32.totalorder %v5155_v54, 127 }
 0x288   : > { %v520_v57 = vpop.permute.xlu0 %519 }
 0x289   : > { %v4493_v41 = vpop.eup %4492  ;;  %v534_v58 = vadd.f32 %v520_v57, %v514_v56  ;;  %v5007_v4 = vadd.f32 %v582_v2, %v520_v57 }
 0x28a   : > { %v565_v59 = vmul.f32 %v4493_v41, %v537_v27 }
 0x28b   : > { %v3472_v61 = vmul.f32 -1.442695, %v534_v58  ;;  %v3476_v12 = vmul.f32 -1.442695, %v5007_v4 }
 0x28c   : > { %4015 = vmatprep.subr.mxu1 %v565_v59  ;;  %654 = vrot.lane.b32.xlu0 %v565_v59, %s4744_s19  ;;  %v572_v62 = vpop.permute.xlu0 %571 }
 0x28d   : > { %v4495_v63 = vpop.eup %4494  ;;  %v583_v0 = vmul.f32 %v572_v62, %v4963_v44  ;;  %4016 = vmatpush3.msra.mxu1 %v565_v59  ;;  %4502 = vpow2.f32 %v3472_v61  ;;  %v624_v61 = vld [vmem:[%s6345_s5 + $0x10] sm:$0xff] }
 0x28e   : > { %v551_v1 = vadd.f32 1.0, %v4495_v63  ;;  %v4497_v47 = vpop.eup %4496  ;;  %v625_v63 = vld [vmem:[%s6345_s5 + $0x18] sm:$0xff] }
 0x28f   : > { %v587_v3 = vadd.f32 %v583_v0, %v524_v32  ;;  %v4499_v6 = vpop.eup %4498  ;;  %v605_v7 = vadd.f32 1.0, %v4497_v47  ;;  %v627_v47 = vld [vmem:[%s6345_s5 + $0x28] sm:$0xff] }
 0x290   : > { %4504 = vrcp.f32 %v551_v1  ;;  %v604_v44 = vadd.f32 1.0, %v4499_v6  ;;  %v626_v1 = vld [vmem:[%s6345_s5 + $0x20] sm:$0xff] }
 0x291   : > { %v3477_v5 = vmul.f32 -1.442695, %v587_v3  ;;  %v3488_v6 = vld [vmem:[%s6345_s5 + $0x80] sm:$0xff] }
 0x293   : > { %v4501_v10 = vpop.eup %4500  ;;  %4506 = vpow2.f32 %v3477_v5  ;;  %v629_v5 = vld [vmem:[%s6345_s5 + $0x38] sm:$0xff] }
 0x294   : > { %v564_v11 = vmul.f32 %v4501_v10, %v536_v36  ;;  %4508 = vrcp.f32 %v605_v7  ;;  %v5060_v36 = vld [vmem:[%s6345_s5 + $0x60] sm:$0xff]  ;;  %v3489_v10 = vld [vmem:[%s6345_s5 + $0x88] sm:$0xff] }
 0x295   : > { %4510 = vpow2.f32 %v3476_v12 }
 0x296   : > { %652 = vrot.lane.b32.xlu1 %v564_v11, %s4744_s19  ;;  %4017 = vmatprep.subr.mxu1 %v564_v11  ;;  %4512 = vrcp.f32 %v604_v44  ;;  %v3490_v44 = vld [vmem:[%s6345_s5 + $0x90] sm:$0xff] }
 0x297   : > { %4018 = vmatpush3.msra.mxu1 %v564_v11 }
 0x29a   : > { %v4503_v13 = vpop.eup %4502 }
 0x29b   : > { %v550_v14 = vadd.f32 1.0, %v4503_v13  ;;  %v3491_v13 = vld [vmem:[%s6345_s5 + $0x98] sm:$0xff] }
 0x29d   : > { %v4505_v15 = vpop.eup %4504  ;;  %4514 = vrcp.f32 %v550_v14 }
 0x29e   : > { %v563_v16 = vmul.f32 %v4505_v15, %v535_v51  ;;  %v5132_v51 = vld [vmem:[%s6342_s2 + $0x18] sm:$0xff] }
 0x2a0   : > { %v4507_v17 = vpop.eup %4506  ;;  %650 = vrot.lane.b32.xlu0 %v563_v16, %s4744_s19  ;;  %4019 = vmatprep.subr.mxu1 %v563_v16 }
 0x2a1   : > { %v603_v18 = vadd.f32 1.0, %v4507_v17  ;;  %4020 = vmatpush3.msra.mxu1 %v563_v16  ;;  %v4509_v20 = vpop.eup %4508  ;;  %v3493_v17 = vld [vmem:[%s6345_s5 + $0xa8] sm:$0xff] }
 0x2a2   : > { %v4511_v21 = vpop.eup %4510  ;;  %v5025_v22 = vmul.f32 %v4509_v20, %v4996_v48  ;;  %v5120_v48 = vld [vmem:[%s6342_s2 + $0x28] sm:$0xff] }
 0x2a3   : > { %4516 = vrcp.f32 %v603_v18  ;;  %v4513_v23 = vpop.eup %4512  ;;  %v602_v24 = vadd.f32 1.0, %v4511_v21  ;;  %v3494_v18 = vld [vmem:[%s6345_s5 + $0xb0] sm:$0xff] }
 0x2a4   : > { %666 = vrot.lane.b32.xlu0 %v565_v59, %s4745_s24  ;;  %v5030_v25 = vmul.f32 %v4513_v23, %v4999_v52  ;;  %v5137_v52 = vld [vmem:[%s6342_s2 + $0x10] sm:$0xff] }
 0x2a5   : > { %4518 = vrcp.f32 %v602_v24 }
 0x2a8   : > { %1122 = vrot.lane.b32.xlu0 %v5025_v22, %s4744_s19 }
 0x2aa   : > { %v4515_v26 = vpop.eup %4514 }
 0x2ab   : > { %v562_v27 = vmul.f32 %v4515_v26, %v534_v58 }
 0x2ac   : > { %1120 = vrot.lane.b32.xlu0 %v5030_v25, %s4744_s19 }
 0x2ad   : > { %648 = vrot.lane.b32.xlu1 %v562_v27, %s4744_s19  ;;  %4021 = vmatprep.subr.mxu1 %v562_v27 }
 0x2ae   : > { %4022 = vmatpush3.msra.mxu1 %v562_v27 }
 0x2af   : > { %4024 = vmatmul.mubr.msk.f32.vlgmr.msra.gmra.mxu1 %vm672_vm1, %v5037_v28 }
 0x2b0   : > { %v4517_v32 = vpop.eup %4516  ;;  %4026 = vmatprep.mubr.msk.f32.mxu1 %vm672_vm1, %v5043_v29 }
 0x2b1   : > { %v5047_v33 = vmul.f32 %v4517_v32, %v587_v3  ;;  %664 = vrot.lane.b32.xlu1 %v564_v11, %s4745_s24  ;;  %v628_v3 = vld [vmem:[%s6345_s5 + $0x30] sm:$0xff] }
 0x2b2   : > { %v4519_v40 = vpop.eup %4518 }
 0x2b3   : > { %1118 = vrot.lane.b32.xlu0 %v5047_v33, %s4744_s19  ;;  %4027 = vmatmul.mubr.msk.f32.gmra.mxu1 %vm672_vm1, %v5054_v34  ;;  %v5094_v43 = vmul.f32 %v4519_v40, %v5007_v4 }
 0x2b4   : > { %4029 = vmatprep.mubr.msk.f32.mxu1 %vm672_vm1, %v5060_v36 }
 0x2b5   : > { %662 = vrot.lane.b32.xlu1 %v563_v16, %s4745_s24  ;;  %v3492_v16 = vld [vmem:[%s6345_s5 + $0xa0] sm:$0xff] }
 0x2b7   : > { %1134 = vrot.lane.b32.xlu0 %v5025_v22, %s4745_s24  ;;  %4030 = vmatmul.mubr.msk.f32.gmra.mxu1 %vm672_vm1, %v5071_v37 }
 0x2b8   : > { %4032 = vmatprep.mubr.msk.f32.mxu1 %vm672_vm1, %v5077_v39 }
 0x2b9   : > { %660 = vrot.lane.b32.xlu1 %v562_v27, %s4745_s24 }
 0x2bb   : > { %1130 = vrot.lane.b32.xlu0 %v5047_v33, %s4745_s24  ;;  %4033 = vmatmul.mubr.msk.f32.gmra.mxu1 %vm672_vm1, %v5088_v42 }
 0x2bc   : > { %4063 = vmatprep.mubr.msk.f32.mxu1 %vm672_vm1, %v622_v19  ;;  %v3495_v19 = vld [vmem:[%s6345_s5 + $0xb8] sm:$0xff] }
 0x2bd   : > { %1116 = vrot.lane.b32.xlu1 %v5094_v43, %s4744_s19 }
 0x2bf   : > { %1105 = vperm.xlu0 %4462, %v5113_v46  }
 0x2c1   : > { %1132 = vrot.lane.b32.xlu1 %v5030_v25, %s4745_s24 }
 0x2c3   : > { %1090 = vperm.xlu0 %4462, %v5125_v49  }
 0x2c5   : > { %1128 = vrot.lane.b32.xlu1 %v5094_v43, %s4745_s24 }
 0x2c7   : > { %1080 = vperm.xlu0 %4462, %v5137_v52  }
 0x2c9   : > { %1100 = vperm.xlu1 %4463, %v5108_v45  }
 0x2cb   : > { %1070 = vperm.xlu0 %4462, %v5149_v53  }
 0x2cd   : > { %1095 = vperm.xlu1 %4463, %v5120_v48  }
 0x2cf   : > { %4468 = vset.pattern.permute.xlu0 %v4743_v9 }
 0x2d1   : > { %1085 = vperm.xlu1 %4463, %v5132_v51  }
 0x2d5   : > { %1075 = vperm.xlu1 %4463, %v5144_v35  }
 0x2d9   : > { %4464 = vset.pattern.permute.xlu1 %v4743_v9 }
 0x2fe   : > { %v655_v55 = vpop.permute.xlu0 %654 }
 0x2ff   : > { %3995 = vmatprep.subr.msk.mxu0 %vm3769_vm2, %v655_v55 }
 0x300   : > { %3996 = vmatpush3.msk.msra.mxu0 %vm3769_vm2, %v655_v55 }
 0x308   : > { %v653_v38 = vpop.permute.xlu1 %652 }
 0x309   : > { %3997 = vmatprep.subr.msk.mxu0 %vm3769_vm2, %v653_v38 }
 0x30a   : > { %3998 = vmatpush3.msk.msra.mxu0 %vm3769_vm2, %v653_v38 }
 0x312   : > { %v651_v56 = vpop.permute.xlu0 %650 }
 0x313   : > { %3999 = vmatprep.subr.msk.mxu0 %vm3769_vm2, %v651_v56 }
 0x314   : > { %4000 = vmatpush3.msk.msra.mxu0 %vm3769_vm2, %v651_v56 }
 0x316   : > { %v667_v57 = vpop.permute.xlu0 %666 }
 0x31a   : > { %v1123_v41 = vpop.permute.xlu0 %1122 }
 0x31b   : > { %4055 = vmatprep.subr.msk.mxu1 %vm3769_vm2, %v1123_v41 }
 0x31c   : > { %4056 = vmatpush3.msk.msra.mxu1 %vm3769_vm2, %v1123_v41 }
 0x31e   : > { %v1121_v58 = vpop.permute.xlu0 %1120 }
 0x31f   : > { %4057 = vmatprep.subr.msk.mxu1 %vm3769_vm2, %v1121_v58  ;;  %v649_v59 = vpop.permute.xlu1 %648 }
 0x320   : > { %4058 = vmatpush3.msk.msra.mxu1 %vm3769_vm2, %v1121_v58  ;;  %4001 = vmatprep.subr.msk.mxu0 %vm3769_vm2, %v649_v59 }
 0x321   : > { %4002 = vmatpush3.msk.msra.mxu0 %vm3769_vm2, %v649_v59 }
 0x322   : > { %4004 = vmatmul.mubr.msk.f32.vlgmr.msra.gmra.mxu0 %vm672_vm1, %v623_v60  ;;  %4035 = vmatprep.subr.msk.mxu0 %vm3770_vm3, %v667_v57 }
 0x323   : > { %v665_v62 = vpop.permute.xlu1 %664  ;;  %4036 = vmatpush3.msk.msra.mxu0 %vm3770_vm3, %v667_v57  ;;  %4006 = vmatprep.mubr.msk.f32.mxu0 %vm672_vm1, %v624_v61 }
 0x324   : > { %4037 = vmatprep.subr.msk.mxu0 %vm3770_vm3, %v665_v62 }
 0x325   : > { %v1119_v0 = vpop.permute.xlu0 %1118  ;;  %4038 = vmatpush3.msk.msra.mxu0 %vm3770_vm3, %v665_v62 }
 0x326   : > { %4059 = vmatprep.subr.msk.mxu1 %vm3769_vm2, %v1119_v0  ;;  %4007 = vmatmul.mubr.msk.f32.gmra.mxu0 %vm672_vm1, %v625_v63 }
 0x327   : > { %4060 = vmatpush3.msk.msra.mxu1 %vm3769_vm2, %v1119_v0  ;;  %v663_v2 = vpop.permute.xlu1 %662  ;;  %4009 = vmatprep.mubr.msk.f32.mxu0 %vm672_vm1, %v626_v1 }
 0x328   : > { %4039 = vmatprep.subr.msk.mxu0 %vm3770_vm3, %v663_v2 }
 0x329   : > { %4040 = vmatpush3.msk.msra.mxu0 %vm3770_vm3, %v663_v2  ;;  %v1135_v11 = vpop.permute.xlu0 %1134 }
 0x32a   : > { %4010 = vmatmul.mubr.msk.f32.gmra.mxu0 %vm672_vm1, %v627_v47 }
 0x32b   : > { %v661_v4 = vpop.permute.xlu1 %660  ;;  %4012 = vmatprep.mubr.msk.f32.mxu0 %vm672_vm1, %v628_v3 }
 0x32c   : > { %4041 = vmatprep.subr.msk.mxu0 %vm3770_vm3, %v661_v4 }
 0x32d   : > { %4042 = vmatpush3.msk.msra.mxu0 %vm3770_vm3, %v661_v4  ;;  %v1131_v14 = vpop.permute.xlu0 %1130 }
 0x32e   : > { %4013 = vmatmul.mubr.msk.f32.gmra.mxu0 %vm672_vm1, %v629_v5  ;;  %4075 = vmatprep.subr.mxu0 %v5025_v22 }
 0x32f   : > { %v1117_v7 = vpop.permute.xlu1 %1116  ;;  %4043 = vmatprep.mubr.msk.f32.mxu0 %vm672_vm1, %v3488_v6 }
 0x330   : > { %4061 = vmatprep.subr.msk.mxu1 %vm3769_vm2, %v1117_v7 }
 0x331   : > { %4062 = vmatpush3.msk.msra.mxu1 %vm3769_vm2, %v1117_v7 }
 0x332   : > { %4044 = vmatmul.mubr.msk.f32.vlgmr.msra.gmra.mxu0 %vm672_vm1, %v3489_v10  ;;  %4064 = vmatmul.mubr.msk.f32.vlgmr.msra.gmra.mxu1 %vm672_vm1, %v623_v60 }
 0x333   : > { %4076 = vmatpush3.msra.mxu0 %v5025_v22  ;;  %4095 = vmatprep.subr.msk.mxu1 %vm3770_vm3, %v1135_v11  ;;  %v1133_v12 = vpop.permute.xlu1 %1132 }
 0x334   : > { %4077 = vmatprep.subr.mxu0 %v5030_v25  ;;  %4096 = vmatpush3.msk.msra.mxu1 %vm3770_vm3, %v1135_v11 }
 0x335   : > { %4078 = vmatpush3.msra.mxu0 %v5030_v25  ;;  %4097 = vmatprep.subr.msk.mxu1 %vm3770_vm3, %v1133_v12 }
 0x336   : > { %4046 = vmatprep.mubr.msk.f32.mxu0 %vm672_vm1, %v3490_v44  ;;  %4066 = vmatprep.mubr.msk.f32.mxu1 %vm672_vm1, %v624_v61 }
 0x337   : > { %4079 = vmatprep.subr.mxu0 %v5047_v33  ;;  %4098 = vmatpush3.msk.msra.mxu1 %vm3770_vm3, %v1133_v12  ;;  %v1129_v15 = vpop.permute.xlu1 %1128 }
 0x338   : > { %4047 = vmatmul.mubr.msk.f32.gmra.mxu0 %vm672_vm1, %v3491_v13  ;;  %4067 = vmatmul.mubr.msk.f32.gmra.mxu1 %vm672_vm1, %v625_v63 }
 0x339   : > { %4080 = vmatpush3.msra.mxu0 %v5047_v33  ;;  %4099 = vmatprep.subr.msk.mxu1 %vm3770_vm3, %v1131_v14 }
 0x33a   : > { %4081 = vmatprep.subr.mxu0 %v5094_v43  ;;  %4100 = vmatpush3.msk.msra.mxu1 %vm3770_vm3, %v1131_v14  ;;  %v1106_v41 = vpop.permute.xlu0 %1105 }
 0x33b   : > { %4082 = vmatpush3.msra.mxu0 %v5094_v43  ;;  %4101 = vmatprep.subr.msk.mxu1 %vm3770_vm3, %v1129_v15 }
 0x33c   : > { %4049 = vmatprep.mubr.msk.f32.mxu0 %vm672_vm1, %v3492_v16  ;;  %4069 = vmatprep.mubr.msk.f32.mxu1 %vm672_vm1, %v626_v1 }
 0x33d   : > { %4102 = vmatpush3.msk.msra.mxu1 %vm3770_vm3, %v1129_v15  ;;  %4050 = vmatmul.mubr.msk.f32.gmra.mxu0 %vm672_vm1, %v3493_v17 }
 0x33e   : > { %4070 = vmatmul.mubr.msk.f32.gmra.mxu1 %vm672_vm1, %v627_v47  ;;  %4052 = vmatprep.mubr.msk.f32.mxu0 %vm672_vm1, %v3494_v18  ;;  %v1091_v7 = vpop.permute.xlu0 %1090 }
 0x33f   : > { %4072 = vmatprep.mubr.msk.f32.mxu1 %vm672_vm1, %v628_v3 }
 0x341   : > { %4053 = vmatmul.mubr.msk.f32.gmra.mxu0 %vm672_vm1, %v3495_v19 }
 0x342   : > { %4073 = vmatmul.mubr.msk.f32.gmra.mxu1 %vm672_vm1, %v629_v5  ;;  %4083 = vmatprep.mubr.msk.f32.mxu0 %vm672_vm1, %v5014_v50 }
 0x343   : > { %4103 = vmatprep.mubr.msk.f32.mxu1 %vm672_vm1, %v3488_v6 }
 0x344   : > { %v5346_v55 = vpop.permute.xlu1 %1100 }
 0x345   : > { %4084 = vmatmul.mubr.msk.f32.vlgmr.msra.gmra.mxu0 %vm672_vm1, %v5037_v28 }
 0x346   : > { %4104 = vmatmul.mubr.msk.f32.vlgmr.msra.gmra.mxu1 %vm672_vm1, %v3489_v10  ;;  %4086 = vmatprep.mubr.msk.f32.mxu0 %vm672_vm1, %v5043_v29 }
 0x347   : > { %4106 = vmatprep.mubr.msk.f32.mxu1 %vm672_vm1, %v3490_v44 }
 0x348   : > { %v1096_v62 = vpop.permute.xlu1 %1095 }
 0x349   : > { %4087 = vmatmul.mubr.msk.f32.gmra.mxu0 %vm672_vm1, %v5054_v34 }
 0x34a   : > { %4107 = vmatmul.mubr.msk.f32.gmra.mxu1 %vm672_vm1, %v3491_v13  ;;  %4089 = vmatprep.mubr.msk.f32.mxu0 %vm672_vm1, %v5060_v36 }
 0x34b   : > { %4109 = vmatprep.mubr.msk.f32.mxu1 %vm672_vm1, %v3492_v16 }
 0x34d   : > { %4090 = vmatmul.mubr.msk.f32.gmra.mxu0 %vm672_vm1, %v5071_v37 }
 0x34e   : > { %4110 = vmatmul.mubr.msk.f32.gmra.mxu1 %vm672_vm1, %v3493_v17  ;;  %4092 = vmatprep.mubr.msk.f32.mxu0 %vm672_vm1, %v5077_v39 }
 0x34f   : > { %4112 = vmatprep.mubr.msk.f32.mxu1 %vm672_vm1, %v3494_v18 }
 0x351   : > { %4093 = vmatmul.mubr.msk.f32.gmra.mxu0 %vm672_vm1, %v5088_v42 }
 0x352   : > { %4113 = vmatmul.mubr.msk.f32.gmra.mxu1 %vm672_vm1, %v3495_v19 }
 0x36f   : > { %v5322_v50 = vpop.f32.mrf.mxu1 }
 0x371   : > { %v5324_v20 = vpop.f32.mrf.mxu1 }
 0x373   : > { %v5326_v21 = vpop.f32.mrf.mxu1 }
 0x375   : > { %v5328_v22 = vpop.f32.mrf.mxu1 }
 0x377   : > { %v4031_v24 = vpop.f32.mrf.mxu1 }
 0x379   : > { %v912_v27 = vpop.f32.mrf.mxu1 }
 0x37b   : > { %v4034_v32 = vpop.f32.mrf.mxu1 }
 0x37d   : > { %v922_v36 = vpop.f32.mrf.mxu1 }
 0x3e2   : > { %v5330_v23 = vpop.f32.mrf.mxu0 }
 0x3e4   : > { %v5332_v25 = vpop.f32.mrf.mxu0 }
 0x3e6   : > { %v5334_v26 = vpop.f32.mrf.mxu0 }
 0x3e8   : > { %v5336_v28 = vpop.f32.mrf.mxu0 }
 0x3ea   : > { %v4011_v29 = vpop.f32.mrf.mxu0 }
 0x3eb   : > { %v918_v57 = vadd.f32 %v4031_v24, %v4011_v29 }
 0x3ec   : > { %v783_v33 = vpop.f32.mrf.mxu0 }
 0x3ed   : > { %v913_v59 = vadd.f32 %v912_v27, %v783_v33 }
 0x3ee   : > { %v4014_v34 = vpop.f32.mrf.mxu0 }
 0x3ef   : > { %v928_v0 = vadd.f32 %v4034_v32, %v4014_v34 }
 0x3f0   : > { %v793_v37 = vpop.f32.mrf.mxu0 }
 0x3f1   : > { %v923_v4 = vadd.f32 %v922_v36, %v793_v37 }
 0x3f2   : > { %v5338_v39 = vpop.f32.mrf.mxu0  ;;  %v5340_v40 = vpop.f32.mrf.mxu1 }
 0x3f4   : > { %v5342_v42 = vpop.f32.mrf.mxu0  ;;  %v5344_v43 = vpop.f32.mrf.mxu1 }
 0x3f8   : > { %v4048_v31 = vpop.f32.mrf.mxu0  ;;  %v4068_v30 = vpop.f32.mrf.mxu1 }
 0x3fa   : > { %v5348_v38 = vpop.f32.mrf.mxu0  ;;  %v5350_v56 = vpop.f32.mrf.mxu1 }
 0x3fd   : > { %v4051_v58 = vpop.f32.mrf.mxu0 }
 0x3fe   : > { %v1065_v60 = vadd.f32 %v4051_v58, %v918_v57  ;;  %v4071_v61 = vpop.f32.mrf.mxu1 }
 0x3ff   : > { %v1041_v63 = vpop.f32.mrf.mxu0 }
 0x400   : > { %v1064_v1 = vadd.f32 %v1041_v63, %v913_v59  ;;  %v1226_v2 = vpop.f32.mrf.mxu1  ;;  %v5352_v47 = vadd.f32 %v1096_v62, %v1065_v60 }
 0x401   : > { %v4054_v3 = vpop.f32.mrf.mxu0 }
 0x402   : > { %v1067_v5 = vadd.f32 %v4054_v3, %v928_v0  ;;  %v4074_v6 = vpop.f32.mrf.mxu1  ;;  %1481 = vadd.xlane.f32.xlu0 %v5352_v47  ;;  %v5357_v13 = vadd.f32 %v1091_v7, %v1064_v1 }
 0x403   : > { %v1051_v10 = vpop.f32.mrf.mxu0 }
 0x404   : > { %v1066_v11 = vadd.f32 %v1051_v10, %v923_v4  ;;  %v1236_v12 = vpop.f32.mrf.mxu1  ;;  %v5355_v44 = vadd.f32 %v1106_v41, %v1067_v5  ;;  %v908_v4 = vadd.f32 %v5326_v21, %v5334_v26  ;;  %v1086_v21 = vpop.permute.xlu1 %1085 }
 0x405   : > { %v4085_v14 = vpop.f32.mrf.mxu0 }
 0x406   : > { %v4105_v15 = vpop.f32.mrf.mxu1  ;;  %1485 = vadd.xlane.f32.xlu1 %v5355_v44  ;;  %1479 = vadd.xlane.f32.xlu0 %v5357_v13  ;;  %v5362_v18 = vadd.f32 %v5346_v55, %v1066_v11 }
 0x407   : > { %v1311_v16 = vpop.f32.mrf.mxu0 }
 0x408   : > { %v1416_v17 = vpop.f32.mrf.mxu1 }
 0x409   : > { %v4088_v19 = vpop.f32.mrf.mxu0 }
 0x40a   : > { %v4108_v24 = vpop.f32.mrf.mxu1  ;;  %1483 = vadd.xlane.f32.xlu0 %v5362_v18  ;;  %v1327_v60 = vadd.f32 %v4088_v19, %v4068_v30  ;;  %v903_v30 = vadd.f32 %v5328_v22, %v5336_v28  ;;  %v1081_v28 = vpop.permute.xlu0 %1080 }
 0x40b   : > { %v1321_v27 = vpop.f32.mrf.mxu0 }
 0x40c   : > { %v1426_v29 = vpop.f32.mrf.mxu1  ;;  %v1458_v11 = vadd.f32 %v4108_v24, %v1327_v60  ;;  %v1062_v26 = vadd.f32 %v5348_v38, %v903_v30 }
 0x40d   : > { %v4091_v32 = vpop.f32.mrf.mxu0 }
 0x40e   : > { %v1337_v33 = vadd.f32 %v4091_v32, %v4071_v61  ;;  %v4111_v34 = vpop.f32.mrf.mxu1  ;;  %v1063_v61 = vadd.f32 %v4048_v31, %v908_v4  ;;  %v5393_v24 = vadd.f32 %v1081_v28, %v1062_v26 }
 0x40f   : > { %v1331_v36 = vpop.f32.mrf.mxu0 }
 0x410   : > { %v1460_v37 = vadd.f32 %v4111_v34, %v1337_v33  ;;  %v1332_v57 = vadd.f32 %v1331_v36, %v1226_v2  ;;  %v1436_v58 = vpop.f32.mrf.mxu1  ;;  %v5380_v19 = vadd.f32 %v1086_v21, %v1063_v61  ;;  %v1076_v34 = vpop.permute.xlu1 %1075 }
 0x411   : > { %v4094_v59 = vpop.f32.mrf.mxu0 }
 0x412   : > { %v1459_v63 = vadd.f32 %v1436_v58, %v1332_v57  ;;  %v1347_v0 = vadd.f32 %v4094_v59, %v4074_v6  ;;  %v4114_v1 = vpop.f32.mrf.mxu1  ;;  %v5365_v3 = vadd.f32 %v1460_v37, %v1096_v62  ;;  %v1322_v62 = vadd.f32 %v1321_v27, %v5350_v56 }
 0x413   : > { %v1341_v5 = vpop.f32.mrf.mxu0  ;;  %v893_v27 = vadd.f32 %v5324_v20, %v5332_v25 }
 0x414   : > { %v1462_v10 = vadd.f32 %v4114_v1, %v1347_v0  ;;  %1497 = vadd.xlane.f32.xlu1 %v5365_v3  ;;  %v1342_v32 = vadd.f32 %v1341_v5, %v1236_v12  ;;  %v5372_v2 = vadd.f32 %v1459_v63, %v1091_v7  ;;  %v1446_v6 = vpop.f32.mrf.mxu1  ;;  %v898_v7 = vadd.f32 %v5322_v50, %v5330_v23 }
 0x415   : > { %v1317_v12 = vadd.f32 %v4085_v14, %v5340_v40  ;;  %v1457_v38 = vadd.f32 %v1426_v29, %v1322_v62  ;;  %v1060_v50 = vadd.f32 %v5342_v42, %v893_v27  ;;  %v5444_v27 = vld [vmem:[#allocation5 + $0x30] sm:$0xff] }
 0x416   : > { %v5370_v33 = vadd.f32 %v1462_v10, %v1106_v41  ;;  %v1461_v31 = vadd.f32 %v1446_v6, %v1342_v32  ;;  %v5382_v41 = vadd.f32 %v1458_v11, %v1086_v21  ;;  %v1061_v22 = vadd.f32 %v5338_v39, %v898_v7  ;;  %v5426_v7 = vld [vmem:[#allocation5 + $0x8] sm:$0xff] }
 0x417   : > { %v1456_v23 = vadd.f32 %v4105_v15, %v1317_v12  ;;  %v1312_v39 = vadd.f32 %v1311_v16, %v5344_v43  ;;  %v5403_v14 = vadd.f32 %v1457_v38, %v1081_v28  ;;  %v1511_v43 = vld [vmem:[#allocation5] sm:$0xff]  ;;  %v5434_v28 = vld [vmem:[#allocation5 + $0x18] sm:$0xff]  ;;  %v5442_v38 = vld [vmem:[#allocation5 + $0x28] sm:$0xff] }
 0x418   : > { %1501 = vadd.xlane.f32.xlu0 %v5370_v33  ;;  %1495 = vadd.xlane.f32.xlu1 %v5372_v2  ;;  %v5391_v56 = vadd.f32 %v1461_v31, %v5346_v55  ;;  %v5401_v40 = vadd.f32 %v1076_v34, %v1061_v22  ;;  %v1071_v55 = vpop.permute.xlu0 %1070  ;;  %v5428_v22 = vld [vmem:[#allocation5 + $0x10] sm:$0xff]  ;;  %v5436_v12 = vld [vmem:[#allocation5 + $0x20] sm:$0xff] }
 0x419   : > { %v1455_v20 = vadd.f32 %v1416_v17, %v1312_v39  ;;  %v5407_v25 = vadd.f32 %v1456_v23, %v1076_v34  ;;  %v5409_v29 = vadd.f32 %v1071_v55, %v1060_v50  ;;  %4131 = vmatprep.mubr.msk.f32.mxu0 %vm1519_vm4, %v1511_v43  ;;  %4159 = vmatprep.mubr.msk.f32.mxu1 %vm1519_vm4, %v1511_v43  ;;  %v5450_v34 = vld [vmem:[#allocation5 + $0x38] sm:$0xff] }
 0x41b   : > { %v5413_v42 = vadd.f32 %v1455_v20, %v1071_v55 }
 0x41c   : > { %1477 = vadd.xlane.f32.xlu0 %v5380_v19  ;;  %1493 = vadd.xlane.f32.xlu1 %v5382_v41 }
 0x420   : > { %1499 = vadd.xlane.f32.xlu1 %v5391_v56  ;;  %1475 = vadd.xlane.f32.xlu0 %v5393_v24 }
 0x424   : > { %1473 = vadd.xlane.f32.xlu0 %v5401_v40  ;;  %1491 = vadd.xlane.f32.xlu1 %v5403_v14 }
 0x428   : > { %1489 = vadd.xlane.f32.xlu1 %v5407_v25  ;;  %1471 = vadd.xlane.f32.xlu0 %v5409_v29 }
 0x42c   : > { %1487 = vadd.xlane.f32.xlu1 %v5413_v42 }
 0x48b   : > { %v1482_v15 = vpop.xlane.xlu0 %1481 }
 0x48f   : > { %v1480_v16 = vpop.xlane.xlu0 %1479  ;;  %v1486_v17 = vpop.xlane.xlu1 %1485 }
 0x493   : > { %v1484_v36 = vpop.xlane.xlu0 %1483 }
 0x49d   : > { %v1498_v37 = vpop.xlane.xlu1 %1497 }
 0x49e   : > { %v1508_v5 = vsel %vm377_vm0, %v1482_v15, %v1498_v37 }
 0x4a1   : > { %v1496_v57 = vpop.xlane.xlu1 %1495  ;;  %v1502_v58 = vpop.xlane.xlu0 %1501 }
 0x4a2   : > { %v1510_v59 = vsel %vm377_vm0, %v1486_v17, %v1502_v58  ;;  %v1507_v61 = vsel %vm377_vm0, %v1480_v16, %v1496_v57 }
 0x4a3   : > { %4115 = vmatprep.subr.mxu0 %v1510_v59 }
 0x4a4   : > { %4116 = vmatpush3.msra.mxu0 %v1510_v59 }
 0x4a5   : > { %v1494_v60 = vpop.xlane.xlu1 %1493  ;;  %v1478_v63 = vpop.xlane.xlu0 %1477 }
 0x4a6   : > { %v1506_v32 = vsel %vm377_vm0, %v1478_v63, %v1494_v60 }
 0x4a9   : > { %v1500_v0 = vpop.xlane.xlu1 %1499  ;;  %v1476_v1 = vpop.xlane.xlu0 %1475 }
 0x4aa   : > { %v1509_v4 = vsel %vm377_vm0, %v1484_v36, %v1500_v0 }
 0x4ab   : > { %4117 = vmatprep.subr.mxu0 %v1509_v4 }
 0x4ac   : > { %4118 = vmatpush3.msra.mxu0 %v1509_v4 }
 0x4ad   : > { %v1492_v10 = vpop.xlane.xlu1 %1491  ;;  %4119 = vmatprep.subr.mxu0 %v1508_v5  ;;  %v1474_v11 = vpop.xlane.xlu0 %1473 }
 0x4ae   : > { %4120 = vmatpush3.msra.mxu0 %v1508_v5  ;;  %v1505_v6 = vsel %vm377_vm0, %v1476_v1, %v1492_v10 }
 0x4af   : > { %4121 = vmatprep.subr.mxu0 %v1507_v61 }
 0x4b0   : > { %4122 = vmatpush3.msra.mxu0 %v1507_v61 }
 0x4b1   : > { %v1490_v30 = vpop.xlane.xlu1 %1489  ;;  %4123 = vmatprep.subr.mxu0 %v1506_v32  ;;  %v1472_v26 = vpop.xlane.xlu0 %1471 }
 0x4b2   : > { %4124 = vmatpush3.msra.mxu0 %v1506_v32  ;;  %v1504_v21 = vsel %vm377_vm0, %v1474_v11, %v1490_v30 }
 0x4b3   : > { %4125 = vmatprep.subr.mxu0 %v1505_v6 }
 0x4b4   : > { %4126 = vmatpush3.msra.mxu0 %v1505_v6 }
 0x4b5   : > { %v1488_v62 = vpop.xlane.xlu1 %1487  ;;  %4127 = vmatprep.subr.mxu0 %v1504_v21 }
 0x4b6   : > { %4128 = vmatpush3.msra.mxu0 %v1504_v21  ;;  %v1503_v31 = vsel %vm377_vm0, %v1472_v26, %v1488_v62 }
 0x4b7   : > { %4129 = vmatprep.subr.mxu0 %v1503_v31 }
 0x4b8   : > { %4130 = vmatpush3.msra.mxu0 %v1503_v31 }
 0x4b9   : > { %4132 = vmatmul.mubr.msk.f32.vlgmr.msra.gmra.mxu0 %vm1519_vm4, %v5426_v7 }
 0x4ba   : > { %4134 = vmatprep.mubr.msk.f32.mxu0 %vm1519_vm4, %v5428_v22 }
 0x4bd   : > { %4135 = vmatmul.mubr.msk.f32.gmra.mxu0 %vm1519_vm4, %v5434_v28 }
 0x4be   : > { %4137 = vmatprep.mubr.msk.f32.mxu0 %vm1519_vm4, %v5436_v12 }
 0x4c1   : > { %4138 = vmatmul.mubr.msk.f32.gmra.mxu0 %vm1519_vm4, %v5442_v38 }
 0x4c2   : > { %4140 = vmatprep.mubr.msk.f32.mxu0 %vm1519_vm4, %v5444_v27 }
 0x4c5   : > { %4141 = vmatmul.mubr.msk.f32.gmra.mxu0 %vm1519_vm4, %v5450_v34 }
 0x579   : > { %v4133_v50 = vpop.f32.mrf.mxu0 }
 0x57b   : > { %v1610_v23 = vpop.f32.mrf.mxu0 }
 0x57d   : > { %v4136_v39 = vpop.f32.mrf.mxu0 }
 0x57e   : > { %1666 = vperm.xlu1 %4464, %v4136_v39  }
 0x57f   : > { %v1620_v55 = vpop.f32.mrf.mxu0 }
 0x581   : > { %v4139_v20 = vpop.f32.mrf.mxu0 }
 0x582   : > { %1661 = vperm.xlu1 %4464, %v1620_v55  }
 0x583   : > { %v1630_v43 = vpop.f32.mrf.mxu0 }
 0x585   : > { %v4142_v15 = vpop.f32.mrf.mxu0 }
 0x586   : > { %1676 = vperm.xlu1 %4464, %v4139_v20   ;;  %1686 = vperm.xlu0 %4468, %v4142_v15  }
 0x587   : > { %v1640_v16 = vpop.f32.mrf.mxu0 }
 0x58a   : > { %4465 = vset.pattern.permute.xlu1 %v4742_v8  ;;  %1656 = vperm.xlu0 %4468, %v4133_v50  }
 0x58b   : > { %1718 = vperm.xlu1 %4465, %v4139_v20  }
 0x58e   : > { %4471 = vset.pattern.permute.xlu0 %v4742_v8 }
 0x58f   : > { %4466 = vset.pattern.permute.xlu1 %v4743_v9  ;;  %1710 = vperm.xlu0 %4471, %v4136_v39  }
 0x590   : > { %1671 = vperm.xlu1 %4466, %v1630_v43  }
 0x593   : > { %1698 = vperm.xlu0 %4471, %v1610_v23  }
 0x594   : > { %4467 = vset.pattern.permute.xlu1 %v4742_v8 }
 0x595   : > { %1714 = vperm.xlu1 %4467, %v1630_v43  }
 0x597   : > { %4473 = vset.pattern.permute.xlu0 %v4743_v9 }
 0x599   : > { %1726 = vperm.xlu1 %4467, %v4142_v15  }
 0x59d   : > { %4469 = vset.pattern.permute.xlu1 %v4743_v9 }
 0x59e   : > { %1681 = vperm.xlu1 %4469, %v1640_v16  }
 0x5a2   : > { %4470 = vset.pattern.permute.xlu1 %v4742_v8 }
 0x5a3   : > { %1722 = vperm.xlu1 %4470, %v1640_v16  }
 0x5a7   : > { %1706 = vperm.xlu1 %4470, %v1620_v55  }
 0x5ab   : > { %1702 = vperm.xlu1 %4470, %v4133_v50  }
 0x5af   : > { %4472 = vset.pattern.permute.xlu1 %v4743_v9 }
 0x5b0   : > { %1651 = vperm.xlu1 %4472, %v1610_v23  }
 0x5f9   : > { %v1667_v17 = vpop.permute.xlu1 %1666 }
 0x5fa   : > { %v5463_v36 = vsub.f32 %v5380_v19, %v1667_v17 }
 0x5fc   : > { %v1740_v37 = vmul.f32 %v5463_v36, %v5463_v36 }
 0x5fd   : > { %v1662_v57 = vpop.permute.xlu1 %1661 }
 0x5fe   : > { %1751 = vadd.xlane.f32.xlu0 %v1740_v37 }
 0x601   : > { %v1677_v58 = vpop.permute.xlu1 %1676  ;;  %v1687_v59 = vpop.permute.xlu0 %1686 }
 0x602   : > { %v5468_v60 = vsub.f32 %v5352_v47, %v1677_v58 }
 0x604   : > { %v1742_v63 = vmul.f32 %v5468_v60, %v5468_v60 }
 0x605   : > { %v1657_v0 = vpop.permute.xlu0 %1656 }
 0x606   : > { %v1719_v1 = vpop.permute.xlu1 %1718  ;;  %1755 = vadd.xlane.f32.xlu0 %v1742_v63  ;;  %v5514_v39 = vsub.f32 %v5401_v40, %v1657_v0 }
 0x607   : > { %v5479_v61 = vsub.f32 %v5365_v3, %v1719_v1  ;;  %v5491_v3 = vsub.f32 %v5355_v44, %v1687_v59  ;;  %v5506_v44 = vsub.f32 %v5393_v24, %v1662_v57 }
 0x608   : > { %v1738_v43 = vmul.f32 %v5514_v39, %v5514_v39 }
 0x609   : > { %v1744_v62 = vmul.f32 %v5491_v3, %v5491_v3  ;;  %v1739_v55 = vmul.f32 %v5506_v44, %v5506_v44 }
 0x60a   : > { %v1711_v4 = vpop.permute.xlu0 %1710 }
 0x60b   : > { %v5473_v19 = vsub.f32 %v5382_v41, %v1711_v4  ;;  %v1672_v5 = vpop.permute.xlu1 %1671  ;;  %v1766_v41 = vmul.f32 %v5479_v61, %v5479_v61 }
 0x60c   : > { %v5476_v10 = vsub.f32 %v5357_v13, %v1672_v5 }
 0x60d   : > { %v1764_v47 = vmul.f32 %v5473_v19, %v5473_v19 }
 0x60e   : > { %v1741_v11 = vmul.f32 %v5476_v10, %v5476_v10  ;;  %v1699_v40 = vpop.permute.xlu0 %1698 }
 0x60f   : > { %1775 = vadd.xlane.f32.xlu1 %v1764_v47  ;;  %v5531_v17 = vsub.f32 %v5413_v42, %v1699_v40 }
 0x610   : > { %v1715_v32 = vpop.permute.xlu1 %1714  ;;  %1753 = vadd.xlane.f32.xlu0 %v1741_v11 }
 0x611   : > { %v5488_v30 = vsub.f32 %v5372_v2, %v1715_v32  ;;  %v1761_v58 = vmul.f32 %v5531_v17, %v5531_v17 }
 0x613   : > { %1779 = vadd.xlane.f32.xlu1 %v1766_v41  ;;  %v1765_v6 = vmul.f32 %v5488_v30, %v5488_v30 }
 0x614   : > { %v1727_v13 = vpop.permute.xlu1 %1726 }
 0x615   : > { %v5496_v21 = vsub.f32 %v5370_v33, %v1727_v13 }
 0x617   : > { %1777 = vadd.xlane.f32.xlu1 %v1765_v6  ;;  %v1768_v26 = vmul.f32 %v5496_v21, %v5496_v21 }
 0x619   : > { %1783 = vadd.xlane.f32.xlu0 %v1768_v26  ;;  %v1682_v2 = vpop.permute.xlu1 %1681 }
 0x61a   : > { %v5503_v31 = vsub.f32 %v5362_v18, %v1682_v2 }
 0x61b   : > { %1759 = vadd.xlane.f32.xlu1 %v1744_v62 }
 0x61c   : > { %v1743_v33 = vmul.f32 %v5503_v31, %v5503_v31 }
 0x61e   : > { %1757 = vadd.xlane.f32.xlu0 %v1743_v33  ;;  %v1723_v50 = vpop.permute.xlu1 %1722 }
 0x61f   : > { %v5511_v23 = vsub.f32 %v5391_v56, %v1723_v50 }
 0x621   : > { %v1767_v18 = vmul.f32 %v5511_v23, %v5511_v23 }
 0x622   : > { %1749 = vadd.xlane.f32.xlu0 %v1739_v55  ;;  %v1707_v24 = vpop.permute.xlu1 %1706 }
 0x623   : > { %v5521_v20 = vsub.f32 %v5403_v14, %v1707_v24  ;;  %1781 = vadd.xlane.f32.xlu1 %v1767_v18 }
 0x625   : > { %v1763_v56 = vmul.f32 %v5521_v20, %v5521_v20 }
 0x626   : > { %1747 = vadd.xlane.f32.xlu0 %v1738_v43  ;;  %v1703_v15 = vpop.permute.xlu1 %1702 }
 0x627   : > { %v5528_v16 = vsub.f32 %v5407_v25, %v1703_v15  ;;  %1773 = vadd.xlane.f32.xlu1 %v1763_v56 }
 0x629   : > { %v1762_v14 = vmul.f32 %v5528_v16, %v5528_v16 }
 0x62b   : > { %1771 = vadd.xlane.f32.xlu1 %v1762_v14  ;;  %v1652_v37 = vpop.permute.xlu1 %1651 }
 0x62c   : > { %v5536_v57 = vsub.f32 %v5409_v29, %v1652_v37 }
 0x62e   : > { %v1737_v59 = vmul.f32 %v5536_v57, %v5536_v57 }
 0x62f   : > { %1769 = vadd.xlane.f32.xlu1 %v1761_v58 }
 0x630   : > { %1745 = vadd.xlane.f32.xlu0 %v1737_v59 }
 0x640   : > { %1931 = vperm.xlu1 %4472, %v5108_v45  }
 0x644   : > { %1927 = vperm.xlu1 %4472, %v5120_v48  }
 0x646   : > { %1935 = vperm.xlu0 %4473, %v5113_v46  }
 0x648   : > { %1923 = vperm.xlu1 %4472, %v5125_v49  }
 0x64c   : > { %1919 = vperm.xlu1 %4472, %v5132_v51  }
 0x650   : > { %1915 = vperm.xlu1 %4472, %v5137_v52  }
 0x654   : > { %1911 = vperm.xlu1 %4472, %v5144_v35  }
 0x658   : > { %1907 = vperm.xlu1 %4472, %v5149_v53  }
 0x65c   : > { %4474 = vset.pattern.permute.xlu1 %v4742_v8 }
 0x65d   : > { %2023 = vperm.xlu1 %4474, %v5113_v46  }
 0x661   : > { %2019 = vperm.xlu1 %4474, %v5108_v45  }
 0x665   : > { %2015 = vperm.xlu1 %4474, %v5120_v48  }
 0x669   : > { %4475 = vset.pattern.permute.xlu1 %v4743_v9 }
 0x687   : > { %v1752_v25 = vpop.xlane.xlu0 %1751 }
 0x68f   : > { %v1756_v42 = vpop.xlane.xlu0 %1755 }
 0x698   : > { %v1776_v29 = vpop.xlane.xlu1 %1775 }
 0x699   : > { %v1754_v0 = vpop.xlane.xlu0 %1753  ;;  %v1788_v11 = vsel %vm377_vm0, %v1752_v25, %v1776_v29 }
 0x69c   : > { %v1780_v63 = vpop.xlane.xlu1 %1779 }
 0x69d   : > { %v1790_v9 = vsel %vm377_vm0, %v1756_v42, %v1780_v63 }
 0x6a0   : > { %v1778_v52 = vpop.xlane.xlu1 %1777 }
 0x6a1   : > { %v1789_v47 = vsel %vm377_vm0, %v1754_v0, %v1778_v52 }
 0x6a2   : > { %v1784_v1 = vpop.xlane.xlu0 %1783 }
 0x6a4   : > { %v1760_v35 = vpop.xlane.xlu1 %1759 }
 0x6a5   : > { %v1792_v53 = vsel %vm377_vm0, %v1760_v35, %v1784_v1 }
 0x6a6   : > { %4143 = vmatprep.subr.mxu1 %v1792_v53 }
 0x6a7   : > { %4144 = vmatpush3.msra.mxu1 %v1792_v53  ;;  %v1758_v4 = vpop.xlane.xlu0 %1757 }
 0x6ab   : > { %v1750_v48 = vpop.xlane.xlu0 %1749 }
 0x6ac   : > { %v1782_v46 = vpop.xlane.xlu1 %1781 }
 0x6ad   : > { %v1791_v45 = vsel %vm377_vm0, %v1758_v4, %v1782_v46 }
 0x6ae   : > { %4145 = vmatprep.subr.mxu1 %v1791_v45 }
 0x6af   : > { %4146 = vmatpush3.msra.mxu1 %v1791_v45  ;;  %v1748_v41 = vpop.xlane.xlu0 %1747 }
 0x6b0   : > { %4147 = vmatprep.subr.mxu1 %v1790_v9  ;;  %v1774_v5 = vpop.xlane.xlu1 %1773 }
 0x6b1   : > { %4148 = vmatpush3.msra.mxu1 %v1790_v9  ;;  %v1787_v13 = vsel %vm377_vm0, %v1750_v48, %v1774_v5 }
 0x6b2   : > { %4149 = vmatprep.subr.mxu1 %v1789_v47 }
 0x6b3   : > { %4150 = vmatpush3.msra.mxu1 %v1789_v47 }
 0x6b4   : > { %4151 = vmatprep.subr.mxu1 %v1788_v11  ;;  %v1772_v32 = vpop.xlane.xlu1 %1771 }
 0x6b5   : > { %4152 = vmatpush3.msra.mxu1 %v1788_v11  ;;  %v1786_v6 = vsel %vm377_vm0, %v1748_v41, %v1772_v32 }
 0x6b6   : > { %4153 = vmatprep.subr.mxu1 %v1787_v13 }
 0x6b7   : > { %4154 = vmatpush3.msra.mxu1 %v1787_v13  ;;  %v5583_v13 = vld [vmem:[%s6342_s2 + $0x10] sm:$0xff] }
 0x6b8   : > { %4155 = vmatprep.subr.mxu1 %v1786_v6  ;;  %v1770_v26 = vpop.xlane.xlu1 %1769 }
 0x6b9   : > { %v1746_v62 = vpop.xlane.xlu0 %1745  ;;  %4156 = vmatpush3.msra.mxu1 %v1786_v6 }
 0x6ba   : > { %v1785_v2 = vsel %vm377_vm0, %v1746_v62, %v1770_v26  ;;  %v5602_v26 = vld [vmem:[%s6346_s6 + $0x40] sm:$0xff] }
 0x6bb   : > { %4157 = vmatprep.subr.mxu1 %v1785_v2 }
 0x6bc   : > { %4158 = vmatpush3.msra.mxu1 %v1785_v2 }
 0x6bd   : > { %4160 = vmatmul.mubr.msk.f32.vlgmr.msra.gmra.mxu1 %vm1519_vm4, %v5426_v7  ;;  %v1932_v7 = vpop.permute.xlu1 %1931 }
 0x6be   : > { %4162 = vmatprep.mubr.msk.f32.mxu1 %vm1519_vm4, %v5428_v22 }
 0x6c1   : > { %4163 = vmatmul.mubr.msk.f32.gmra.mxu1 %vm1519_vm4, %v5434_v28  ;;  %v1928_v28 = vpop.permute.xlu1 %1927  ;;  %v1936_v52 = vpop.permute.xlu0 %1935 }
 0x6c2   : > { %4165 = vmatprep.mubr.msk.f32.mxu1 %vm1519_vm4, %v5436_v12 }
 0x6c5   : > { %4166 = vmatmul.mubr.msk.f32.gmra.mxu1 %vm1519_vm4, %v5442_v38  ;;  %v1924_v15 = vpop.permute.xlu1 %1923 }
 0x6c6   : > { %4168 = vmatprep.mubr.msk.f32.mxu1 %vm1519_vm4, %v5444_v27 }
 0x6c9   : > { %4169 = vmatmul.mubr.msk.f32.gmra.mxu1 %vm1519_vm4, %v5450_v34  ;;  %v1920_v58 = vpop.permute.xlu1 %1919 }
 0x6ca   : > { %4215 = vmatprep.mubr.msk.f32.mxu1 %vm1519_vm4, %v5602_v26 }
 0x6cd   : > { %v1916_v46 = vpop.permute.xlu1 %1915 }
 0x6d1   : > { %v1912_v47 = vpop.permute.xlu1 %1911 }
 0x6d5   : > { %v1908_v41 = vpop.permute.xlu1 %1907 }
 0x77d   : > { %v4161_v33 = vpop.f32.mrf.mxu1 }
 0x77e   : > { %v1865_v59 = vadd.f32 1e-06, %v4161_v33 }
 0x77f   : > { %v1859_v50 = vpop.f32.mrf.mxu1 }
 0x780   : > { %v1860_v42 = vadd.f32 1e-06, %v1859_v50 }
 0x781   : > { %v4164_v55 = vpop.f32.mrf.mxu1 }
 0x782   : > { %v1875_v22 = vadd.f32 1e-06, %v4164_v55 }
 0x783   : > { %v1869_v18 = vpop.f32.mrf.mxu1 }
 0x784   : > { %4520 = vrsqrt.f32 %v1875_v22  ;;  %v1870_v40 = vadd.f32 1e-06, %v1869_v18 }
 0x785   : > { %v4167_v24 = vpop.f32.mrf.mxu1 }
 0x786   : > { %v1885_v43 = vadd.f32 1e-06, %v4167_v24 }
 0x787   : > { %v1879_v12 = vpop.f32.mrf.mxu1 }
 0x788   : > { %4522 = vrsqrt.f32 %v1885_v43  ;;  %v1880_v56 = vadd.f32 1e-06, %v1879_v12 }
 0x789   : > { %v4170_v38 = vpop.f32.mrf.mxu1 }
 0x78a   : > { %4524 = vrsqrt.f32 %v1880_v56  ;;  %v1895_v27 = vadd.f32 1e-06, %v4170_v38 }
 0x78b   : > { %v1889_v14 = vpop.f32.mrf.mxu1 }
 0x78c   : > { %4526 = vrsqrt.f32 %v1895_v27  ;;  %v1890_v34 = vadd.f32 1e-06, %v1889_v14 }
 0x78d   : > { %4528 = vrsqrt.f32 %v1870_v40 }
 0x78e   : > { %4530 = vrsqrt.f32 %v1890_v34 }
 0x78f   : > { %4532 = vrsqrt.f32 %v1865_v59 }
 0x790   : > { %4534 = vrsqrt.f32 %v1860_v42 }
 0x791   : > { %v4521_v37 = vpop.eup %4520 }
 0x792   : > { %v1941_v25 = vmul.f32 %v4521_v37, %v1920_v58 }
 0x794   : > { %1963 = vperm.xlu0 %4473, %v1941_v25  }
 0x795   : > { %v4523_v29 = vpop.eup %4522 }
 0x796   : > { %v1943_v63 = vmul.f32 %v4523_v29, %v1928_v28 }
 0x797   : > { %v4525_v0 = vpop.eup %4524 }
 0x798   : > { %1973 = vperm.xlu0 %4473, %v1943_v63   ;;  %v1942_v53 = vmul.f32 %v4525_v0, %v1924_v15 }
 0x799   : > { %v4527_v1 = vpop.eup %4526 }
 0x79a   : > { %v1945_v35 = vmul.f32 %v4527_v1, %v1936_v52  ;;  %v4529_v4 = vpop.eup %4528 }
 0x79b   : > { %v1940_v45 = vmul.f32 %v4529_v4, %v1916_v46  ;;  %v4531_v48 = vpop.eup %4530 }
 0x79c   : > { %1983 = vperm.xlu1 %4475, %v1945_v35   ;;  %1968 = vperm.xlu0 %4473, %v1942_v53   ;;  %v1944_v9 = vmul.f32 %v4531_v48, %v1932_v7  ;;  %v4533_v5 = vpop.eup %4532 }
 0x79d   : > { %v1939_v11 = vmul.f32 %v4533_v5, %v1912_v47  ;;  %v4535_v32 = vpop.eup %4534 }
 0x79e   : > { %v1938_v6 = vmul.f32 %v4535_v32, %v1908_v41 }
 0x7a0   : > { %4476 = vset.pattern.permute.xlu1 %v4742_v8  ;;  %1958 = vperm.xlu0 %4473, %v1940_v45  }
 0x7a1   : > { %2011 = vperm.xlu1 %4476, %v5125_v49   ;;  %v5589_v49 = vld [vmem:[%s6342_s2 + $0x8] sm:$0xff] }
 0x7a4   : > { %1978 = vperm.xlu0 %4473, %v1944_v9  }
 0x7a5   : > { %2007 = vperm.xlu1 %4476, %v5132_v51   ;;  %v5596_v51 = vld [vmem:[%s6342_s2] sm:$0xff] }
 0x7a8   : > { %1953 = vperm.xlu0 %4473, %v1939_v11  }
 0x7a9   : > { %2003 = vperm.xlu1 %4476, %v5583_v13  }
 0x7ac   : > { %1948 = vperm.xlu0 %4473, %v1938_v6  }
 0x7ad   : > { %1999 = vperm.xlu1 %4476, %v5589_v49  }
 0x7b0   : > { %4477 = vset.pattern.permute.xlu0 %v4742_v8  ;;  %v2024_v8 = vpop.permute.xlu1 %2023 }
 0x7b1   : > { %2119 = vperm.xlu1 %4476, %v1945_v35   ;;  %1995 = vperm.xlu0 %4477, %v5596_v51  }
 0x7b4   : > { %v5606_v62 = vpop.permute.xlu1 %2019 }
 0x7b5   : > { %2115 = vperm.xlu1 %4476, %v1944_v9   ;;  %2111 = vperm.xlu0 %4477, %v1943_v63  }
 0x7b8   : > { %v5608_v33 = vpop.permute.xlu1 %2015 }
 0x7b9   : > { %2107 = vperm.xlu1 %4476, %v1942_v53   ;;  %2103 = vperm.xlu0 %4477, %v1941_v25  }
 0x7bd   : > { %2099 = vperm.xlu1 %4476, %v1940_v45   ;;  %2095 = vperm.xlu0 %4477, %v1939_v11  }
 0x7c1   : > { %2091 = vperm.xlu1 %4476, %v1938_v6  }
 0x80f   : > { %v1964_v2 = vpop.permute.xlu0 %1963 }
 0x810   : > { %v1989_v27 = vmul.f32 %v1964_v2, %v5463_v36 }
 0x813   : > { %v1974_v7 = vpop.permute.xlu0 %1973 }
 0x814   : > { %v1991_v50 = vmul.f32 %v1974_v7, %v5468_v60 }
 0x816   : > { %v5612_v55 = vadd.f32 %v5608_v33, %v1991_v50 }
 0x817   : > { %v1969_v22 = vpop.permute.xlu0 %1968  ;;  %v1984_v18 = vpop.permute.xlu1 %1983 }
 0x818   : > { %v3597_v28 = vmul.f32 -1.442695, %v5612_v55  ;;  %v1993_v24 = vmul.f32 %v1984_v18, %v5491_v3  ;;  %v1990_v12 = vmul.f32 %v1969_v22, %v5476_v10 }
 0x81a   : > { %v5616_v43 = vadd.f32 %v2024_v8, %v1993_v24  ;;  %4536 = vpow2.f32 %v3597_v28 }
 0x81b   : > { %v1959_v56 = vpop.permute.xlu0 %1958 }
 0x81c   : > { %v3599_v38 = vmul.f32 -1.442695, %v5616_v43  ;;  %v5620_v40 = vpop.permute.xlu1 %2011  ;;  %v1988_v58 = vmul.f32 %v1959_v56, %v5506_v44 }
 0x81d   : > { %v5623_v60 = vadd.f32 %v5620_v40, %v1990_v12 }
 0x81e   : > { %4538 = vpow2.f32 %v3599_v38 }
 0x81f   : > { %v1979_v15 = vpop.permute.xlu0 %1978  ;;  %v3596_v14 = vmul.f32 -1.442695, %v5623_v60 }
 0x820   : > { %v1992_v3 = vmul.f32 %v1979_v15, %v5503_v31  ;;  %v5628_v34 = vpop.permute.xlu1 %2007 }
 0x821   : > { %v5631_v10 = vadd.f32 %v5628_v34, %v1989_v27  ;;  %4540 = vpow2.f32 %v3596_v14 }
 0x822   : > { %v5634_v37 = vadd.f32 %v5606_v62, %v1992_v3 }
 0x823   : > { %v3595_v59 = vmul.f32 -1.442695, %v5631_v10  ;;  %v1954_v25 = vpop.permute.xlu0 %1953 }
 0x824   : > { %v3598_v36 = vmul.f32 -1.442695, %v5634_v37  ;;  %v5639_v29 = vpop.permute.xlu1 %2003  ;;  %v1987_v42 = vmul.f32 %v1954_v25, %v5514_v39 }
 0x825   : > { %4542 = vpow2.f32 %v3595_v59  ;;  %v5642_v31 = vadd.f32 %v5639_v29, %v1988_v58 }
 0x826   : > { %4544 = vpow2.f32 %v3598_v36 }
 0x827   : > { %v3594_v63 = vmul.f32 -1.442695, %v5642_v31  ;;  %v1949_v0 = vpop.permute.xlu0 %1948  ;;  %v4537_v52 = vpop.eup %4536 }
 0x828   : > { %v5646_v44 = vpop.permute.xlu1 %1999  ;;  %v2063_v53 = vadd.f32 1.0, %v4537_v52  ;;  %v1986_v4 = vmul.f32 %v1949_v0, %v5536_v57 }
 0x829   : > { %4546 = vpow2.f32 %v3594_v63  ;;  %v5649_v1 = vadd.f32 %v5646_v44, %v1987_v42 }
 0x82b   : > { %v4539_v35 = vpop.eup %4538  ;;  %v3593_v46 = vmul.f32 -1.442695, %v5649_v1 }
 0x82c   : > { %v2065_v45 = vadd.f32 1.0, %v4539_v35  ;;  %v5653_v48 = vpop.permute.xlu0 %1995  ;;  %v2120_v39 = vpop.permute.xlu1 %2119 }
 0x82d   : > { %4548 = vpow2.f32 %v3593_v46  ;;  %v5656_v9 = vadd.f32 %v5653_v48, %v1986_v4  ;;  %v2129_v5 = vmul.f32 %v2120_v39, %v5496_v21 }
 0x82e   : > { %4550 = vrcp.f32 %v2065_v45  ;;  %v4541_v41 = vpop.eup %4540 }
 0x82f   : > { %4552 = vrcp.f32 %v2063_v53  ;;  %v3592_v47 = vmul.f32 -1.442695, %v5656_v9  ;;  %v5660_v11 = vadd.f32 %v2129_v5, %v2024_v8  ;;  %v2062_v21 = vadd.f32 1.0, %v4541_v41 }
 0x830   : > { %v2112_v32 = vpop.permute.xlu0 %2111  ;;  %v2116_v57 = vpop.permute.xlu1 %2115 }
 0x831   : > { %v3607_v6 = vmul.f32 -1.442695, %v5660_v11  ;;  %4554 = vpow2.f32 %v3592_v47  ;;  %v2127_v7 = vmul.f32 %v2112_v32, %v5479_v61  ;;  %v2128_v18 = vmul.f32 %v2116_v57, %v5511_v23 }
 0x832   : > { %v4543_v2 = vpop.eup %4542 }
 0x833   : > { %v4545_v50 = vpop.eup %4544  ;;  %v2061_v22 = vadd.f32 1.0, %v4543_v2  ;;  %4556 = vpow2.f32 %v3607_v6  ;;  %v5666_v56 = vadd.f32 %v2127_v7, %v5608_v33  ;;  %v5669_v38 = vadd.f32 %v2128_v18, %v5606_v62 }
 0x834   : > { %v2064_v28 = vadd.f32 1.0, %v4545_v50  ;;  %v2104_v24 = vpop.permute.xlu0 %2103  ;;  %v2108_v12 = vpop.permute.xlu1 %2107 }
 0x835   : > { %4558 = vrcp.f32 %v2061_v22  ;;  %v2125_v61 = vmul.f32 %v2104_v24, %v5473_v19  ;;  %v2126_v23 = vmul.f32 %v2108_v12, %v5488_v30  ;;  %v3605_v58 = vmul.f32 -1.442695, %v5666_v56  ;;  %v4603_v12 = vld [vmem:[%s4889_s22 + $0x18] sm:$0xff] }
 0x836   : > { %v4547_v8 = vpop.eup %4546  ;;  %4560 = vrcp.f32 %v2064_v28  ;;  %v3606_v36 = vmul.f32 -1.442695, %v5669_v38 }
 0x837   : > { %4562 = vrcp.f32 %v2062_v21  ;;  %v2060_v27 = vadd.f32 1.0, %v4547_v8  ;;  %v5676_v33 = vadd.f32 %v2125_v61, %v5628_v34  ;;  %v5683_v30 = vadd.f32 %v2126_v23, %v5620_v40  ;;  %v5757_v21 = vld [vmem:[%s6346_s6 + $0x48] sm:$0xff]  ;;  %v5769_v8 = vld [vmem:[%s6346_s6 + $0x50] sm:$0xff] }
 0x838   : > { %v2096_v15 = vpop.permute.xlu0 %2095  ;;  %v2100_v14 = vpop.permute.xlu1 %2099  ;;  %v4604_v23 = vld [vmem:[%s4889_s22 + $0x10] sm:$0xff] }
 0x839   : > { %v2123_v62 = vmul.f32 %v2096_v15, %v5528_v16  ;;  %4564 = vrcp.f32 %v2060_v27  ;;  %v2124_v63 = vmul.f32 %v2100_v14, %v5521_v20  ;;  %v3604_v52 = vmul.f32 -1.442695, %v5683_v30  ;;  %v5776_v27 = vld [vmem:[%s6346_s6 + $0x58] sm:$0xff] }
 0x83a   : > { %v4549_v3 = vpop.eup %4548 }
 0x83b   : > { %v4551_v59 = vpop.eup %4550  ;;  %v2059_v25 = vadd.f32 1.0, %v4549_v3  ;;  %v5694_v40 = vadd.f32 %v2123_v62, %v5646_v44  ;;  %v5699_v35 = vadd.f32 %v2124_v63, %v5639_v29 }
 0x83c   : > { %v4553_v42 = vpop.eup %4552  ;;  %v5680_v19 = vmul.f32 %v4551_v59, %v5616_v43  ;;  %v2092_v0 = vpop.permute.xlu1 %2091  ;;  %v3603_v43 = vmul.f32 -1.442695, %v5676_v33  ;;  %v5788_v59 = vld [vmem:[%s6346_s6 + $0x60] sm:$0xff] }
 0x83d   : > { %4566 = vrcp.f32 %v2059_v25  ;;  %v5690_v16 = vmul.f32 %v4553_v42, %v5612_v55  ;;  %v2122_v53 = vmul.f32 %v2092_v0, %v5531_v17  ;;  %v3601_v45 = vmul.f32 -1.442695, %v5694_v40  ;;  %v4606_v42 = vld [vmem:[%s4889_s22] sm:$0xff] }
 0x83e   : > { %4568 = vpow2.f32 %v3605_v58  ;;  %2242 = vrot.lane.b32.xlu0 %v5680_v19, %s4744_s19  ;;  %4199 = vmatprep.subr.mxu1 %v5680_v19  ;;  %v4555_v34 = vpop.eup %4554  ;;  %v3602_v29 = vmul.f32 -1.442695, %v5699_v35  ;;  %v4605_v58 = vld [vmem:[%s4889_s22 + $0x8] sm:$0xff]  ;;  %v5827_v0 = vld [vmem:[%s6347_s7] sm:$0xff] }
 0x83f   : > { %4570 = vpow2.f32 %v3606_v36  ;;  %4200 = vmatpush3.msra.mxu1 %v5680_v19  ;;  %v2058_v20 = vadd.f32 1.0, %v4555_v34  ;;  %v5711_v17 = vadd.f32 %v2122_v53, %v5653_v48  ;;  %v5795_v36 = vld [vmem:[%s6346_s6 + $0x68] sm:$0xff] }
 0x840   : > { %v4557_v4 = vpop.eup %4556 }
 0x841   : > { %4572 = vrcp.f32 %v2058_v20  ;;  %v2169_v47 = vadd.f32 1.0, %v4557_v4  ;;  %v3600_v48 = vmul.f32 -1.442695, %v5711_v17  ;;  %v5849_v4 = vld [vmem:[%s6347_s7 + $0x10] sm:$0xff] }
 0x842   : > { %v4559_v46 = vpop.eup %4558  ;;  %2238 = vrot.lane.b32.xlu0 %v5690_v16, %s4744_s19  ;;  %4574 = vpow2.f32 %v3603_v43  ;;  %v5838_v43 = vld [vmem:[%s6347_s7 + $0x8] sm:$0xff] }
 0x843   : > { %v4561_v55 = vpop.eup %4560  ;;  %v5705_v44 = vmul.f32 %v4559_v46, %v5631_v10  ;;  %4576 = vpow2.f32 %v3604_v52  ;;  %v5717_v10 = vld [vmem:[%s6346_s6] sm:$0xff] }
 0x844   : > { %v2088_v39 = vmul.f32 %v4561_v55, %v5634_v37  ;;  %v4563_v5 = vpop.eup %4562  ;;  %4578 = vpow2.f32 %v3601_v45  ;;  %4187 = vmatprep.mubr.msk.f32.mxu0 %vm1519_vm4, %v5717_v10  ;;  %v5868_v45 = vld [vmem:[%s6347_s7 + $0x20] sm:$0xff] }
 0x845   : > { %v5722_v37 = vmul.f32 %v4563_v5, %v5623_v60  ;;  %4580 = vpow2.f32 %v3602_v29  ;;  %v2200_v5 = vld [vmem:[%s6347_s7 + $0x30] sm:$0xff] }
 0x846   : > { %2240 = vrot.lane.b32.xlu1 %v2088_v39, %s4744_s19  ;;  %4201 = vmatprep.subr.mxu1 %v2088_v39  ;;  %v4565_v32 = vpop.eup %4564  ;;  %4582 = vrcp.f32 %v2169_v47 }
 0x847   : > { %2234 = vrot.lane.b32.xlu0 %v5705_v44, %s4744_s19  ;;  %4202 = vmatpush3.msra.mxu1 %v2088_v39  ;;  %v5737_v2 = vmul.f32 %v4565_v32, %v5642_v31  ;;  %4584 = vpow2.f32 %v3600_v48  ;;  %v4610_v48 = vld [vmem:[%s4889_s22 + $0x20] sm:$0xff]  ;;  %v4747_v32 = vmov 3  }
 0x848   : > { %4203 = vmatprep.subr.mxu1 %v5690_v16  ;;  %4479 = vset.pattern.permute.xlu1 %v4747_v32 }
 0x849   : > { %4204 = vmatpush3.msra.mxu1 %v5690_v16  ;;  %4478 = vset.pattern.permute.xlu0 %v4747_v32 }
 0x84a   : > { %v4567_v57 = vpop.eup %4566  ;;  %2236 = vrot.lane.b32.xlu1 %v5722_v37, %s4744_s19  ;;  %4205 = vmatprep.subr.mxu1 %v5722_v37 }
 0x84b   : > { %v4569_v60 = vpop.eup %4568  ;;  %v5733_v41 = vmul.f32 %v4567_v57, %v5649_v1  ;;  %4206 = vmatpush3.msra.mxu1 %v5722_v37  ;;  %v4611_v57 = vld [vmem:[%s6342_s2 + $0x18] sm:$0xff] }
 0x84c   : > { %v4571_v6 = vpop.eup %4570  ;;  %4207 = vmatprep.subr.mxu1 %v5705_v44  ;;  %v2167_v7 = vadd.f32 1.0, %v4569_v60  ;;  %v4615_v60 = vld [vmem:[%s6342_s2 + $0x30] sm:$0xff] }
 0x84d   : > { %4208 = vmatpush3.msra.mxu1 %v5705_v44  ;;  %2230 = vrot.lane.b32.xlu0 %v5733_v41, %s4744_s19  ;;  %v2168_v22 = vadd.f32 1.0, %v4571_v6 }
 0x84e   : > { %2232 = vrot.lane.b32.xlu1 %v5737_v2, %s4744_s19  ;;  %4209 = vmatprep.subr.mxu1 %v5737_v2  ;;  %v4573_v1 = vpop.eup %4572  ;;  %4586 = vrcp.f32 %v2167_v7 }
 0x84f   : > { %4210 = vmatpush3.msra.mxu1 %v5737_v2  ;;  %v4575_v50 = vpop.eup %4574  ;;  %v5748_v31 = vmul.f32 %v4573_v1, %v5656_v9  ;;  %4588 = vrcp.f32 %v2168_v22 }
 0x850   : > { %4211 = vmatprep.subr.mxu1 %v5733_v41  ;;  %v4577_v18 = vpop.eup %4576  ;;  %v2165_v9 = vadd.f32 1.0, %v4575_v50 }
 0x851   : > { %2266 = vrot.lane.b32.xlu0 %v5680_v19, %s4745_s24  ;;  %4212 = vmatpush3.msra.mxu1 %v5733_v41  ;;  %v4579_v28 = vpop.eup %4578  ;;  %v2166_v24 = vadd.f32 1.0, %v4577_v18  ;;  %v5806_v19 = vld [vmem:[%s6346_s6 + $0x70] sm:$0xff] }
 0x852   : > { %2228 = vrot.lane.b32.xlu1 %v5748_v31, %s4744_s19  ;;  %4213 = vmatprep.subr.mxu1 %v5748_v31  ;;  %v4581_v61 = vpop.eup %4580  ;;  %4590 = vrcp.f32 %v2165_v9  ;;  %v2163_v14 = vadd.f32 1.0, %v4579_v28  ;;  %v5994_v9 = vld [vmem:[%s6346_s6 + $0x10] sm:$0xff] }
 0x853   : > { %4214 = vmatpush3.msra.mxu1 %v5748_v31  ;;  %v4583_v15 = vpop.eup %4582  ;;  %4592 = vrcp.f32 %v2166_v24  ;;  %v2164_v3 = vadd.f32 1.0, %v4581_v61 }
 0x854   : > { %4216 = vmatmul.mubr.msk.f32.vlgmr.msra.gmra.mxu1 %vm1519_vm4, %v5757_v21  ;;  %4255 = vmatprep.subr.mxu1 %v4603_v12  ;;  %v4585_v25 = vpop.eup %4584  ;;  %v5798_v62 = vmul.f32 %v4583_v15, %v5660_v11  ;;  %4594 = vrcp.f32 %v2163_v14  ;;  %v5820_v11 = vld [vmem:[%s6346_s6 + $0x78] sm:$0xff]  ;;  %v6038_v15 = vld [vmem:[%s6346_s6 + $0x30] sm:$0xff] }
 0x855   : > { %2262 = vrot.lane.b32.xlu0 %v5690_v16, %s4745_s24  ;;  %4256 = vmatpush3.msra.mxu1 %v4603_v12  ;;  %4596 = vrcp.f32 %v2164_v3  ;;  %v2162_v63 = vadd.f32 1.0, %v4585_v25  ;;  %v6009_v12 = vld [vmem:[%s6346_s6 + $0x18] sm:$0xff] }
 0x856   : > { %2264 = vrot.lane.b32.xlu1 %v2088_v39, %s4745_s24  ;;  %4257 = vmatprep.subr.mxu1 %v4604_v23 }
 0x857   : > { %4218 = vmatprep.mubr.msk.f32.mxu1 %vm1519_vm4, %v5769_v8  ;;  %4258 = vmatpush3.msra.mxu1 %v4604_v23  ;;  %4598 = vrcp.f32 %v2162_v63  ;;  %v6031_v23 = vld [vmem:[%s6346_s6 + $0x28] sm:$0xff] }
 0x858   : > { %4219 = vmatmul.mubr.msk.f32.gmra.mxu1 %vm1519_vm4, %v5776_v27  ;;  %4259 = vmatprep.subr.mxu1 %v4605_v58 }
 0x859   : > { %2258 = vrot.lane.b32.xlu0 %v5705_v44, %s4745_s24  ;;  %4260 = vmatpush3.msra.mxu1 %v4605_v58  ;;  %v6053_v58 = vld [vmem:[%s6346_s6 + $0x38] sm:$0xff] }
 0x85a   : > { %2260 = vrot.lane.b32.xlu1 %v5722_v37, %s4745_s24  ;;  %4261 = vmatprep.subr.mxu1 %v4606_v42  ;;  %v4608_v37 = vld [vmem:[%s4889_s22 + $0x30] sm:$0xff] }
 0x85b   : > { %4221 = vmatprep.mubr.msk.f32.mxu1 %vm1519_vm4, %v5788_v59  ;;  %4262 = vmatpush3.msra.mxu1 %v4606_v42  ;;  %v4587_v34 = vpop.eup %4586  ;;  %v6082_v42 = vld [vmem:[%s6346_s6 + $0x90] sm:$0xff] }
 0x85c   : > { %4222 = vmatmul.mubr.msk.f32.gmra.mxu1 %vm1519_vm4, %v5795_v36  ;;  %4303 = vmatprep.subr.mxu1 %v5798_v62  ;;  %v4589_v16 = vpop.eup %4588  ;;  %v2191_v20 = vmul.f32 %v4587_v34, %v5666_v56  ;;  %v5856_v56 = vld [vmem:[%s6347_s7 + $0x18] sm:$0xff] }
 0x85d   : > { %2254 = vrot.lane.b32.xlu0 %v5733_v41, %s4745_s24  ;;  %4224 = vmatprep.mubr.msk.f32.mxu1 %vm1519_vm4, %v5806_v19  ;;  %v2192_v53 = vmul.f32 %v4589_v16, %v5669_v38 }
 0x85e   : > { %2256 = vrot.lane.b32.xlu1 %v5737_v2, %s4745_s24 }
 0x85f   : > { %v4591_v52 = vpop.eup %4590 }
 0x860   : > { %4225 = vmatmul.mubr.msk.f32.gmra.mxu1 %vm1519_vm4, %v5820_v11  ;;  %v4593_v46 = vpop.eup %4592  ;;  %v2189_v38 = vmul.f32 %v4591_v52, %v5676_v33  ;;  %v5874_v33 = vld [vmem:[%s6347_s7 + $0x28] sm:$0xff] }
 0x861   : > { %2862 = vrot.lane.b32.xlu0 %v5798_v62, %s4744_s19  ;;  %4263 = vmatprep.mubr.msk.f32.mxu1 %vm672_vm1, %v5827_v0  ;;  %v4595_v55 = vpop.eup %4594  ;;  %v2190_v44 = vmul.f32 %v4593_v46, %v5683_v30 }
 0x862   : > { %2252 = vrot.lane.b32.xlu1 %v5748_v31, %s4745_s24  ;;  %v4597_v39 = vpop.eup %4596  ;;  %v2187_v30 = vmul.f32 %v4595_v55, %v5694_v40  ;;  %v2201_v40 = vld [vmem:[%s6347_s7 + $0x38] sm:$0xff] }
 0x863   : > { %v2188_v29 = vmul.f32 %v4597_v39, %v5699_v35 }
 0x864   : > { %4264 = vmatmul.mubr.msk.f32.vlgmr.msra.gmra.mxu1 %vm672_vm1, %v5838_v43  ;;  %v4599_v47 = vpop.eup %4598 }
 0x865   : > { %4304 = vmatpush3.msra.mxu1 %v5798_v62  ;;  %2858 = vrot.lane.b32.xlu0 %v2191_v20, %s4744_s19  ;;  %v2186_v35 = vmul.f32 %v4599_v47, %v5711_v17  ;;  %v4607_v17 = vld [vmem:[%s4889_s22 + $0x38] sm:$0xff] }
 0x866   : > { %4305 = vmatprep.subr.mxu1 %v2192_v53  ;;  %2860 = vrot.lane.b32.xlu1 %v2192_v53, %s4744_s19 }
 0x867   : > { %4306 = vmatpush3.msra.mxu1 %v2192_v53  ;;  %4266 = vmatprep.mubr.msk.f32.mxu1 %vm672_vm1, %v5849_v4 }
 0x868   : > { %4307 = vmatprep.subr.mxu1 %v2191_v20  ;;  %4267 = vmatmul.mubr.msk.f32.gmra.mxu1 %vm672_vm1, %v5856_v56 }
 0x869   : > { %4308 = vmatpush3.msra.mxu1 %v2191_v20  ;;  %2854 = vrot.lane.b32.xlu0 %v2189_v38, %s4744_s19 }
 0x86a   : > { %4309 = vmatprep.subr.mxu1 %v2190_v44  ;;  %2856 = vrot.lane.b32.xlu1 %v2190_v44, %s4744_s19 }
 0x86b   : > { %4310 = vmatpush3.msra.mxu1 %v2190_v44  ;;  %4269 = vmatprep.mubr.msk.f32.mxu1 %vm672_vm1, %v5868_v45 }
 0x86c   : > { %4311 = vmatprep.subr.mxu1 %v2189_v38  ;;  %4270 = vmatmul.mubr.msk.f32.gmra.mxu1 %vm672_vm1, %v5874_v33 }
 0x86d   : > { %4312 = vmatpush3.msra.mxu1 %v2189_v38  ;;  %2850 = vrot.lane.b32.xlu0 %v2187_v30, %s4744_s19 }
 0x86e   : > { %4313 = vmatprep.subr.mxu1 %v2188_v29  ;;  %2852 = vrot.lane.b32.xlu1 %v2188_v29, %s4744_s19 }
 0x86f   : > { %4314 = vmatpush3.msra.mxu1 %v2188_v29  ;;  %4272 = vmatprep.mubr.msk.f32.mxu1 %vm672_vm1, %v2200_v5 }
 0x870   : > { %4315 = vmatprep.subr.mxu1 %v2187_v30  ;;  %4273 = vmatmul.mubr.msk.f32.gmra.mxu1 %vm672_vm1, %v2201_v40 }
 0x871   : > { %4316 = vmatpush3.msra.mxu1 %v2187_v30  ;;  %2886 = vrot.lane.b32.xlu0 %v5798_v62, %s4745_s24  ;;  %v6075_v62 = vld [vmem:[%s6346_s6 + $0x88] sm:$0xff] }
 0x872   : > { %4317 = vmatprep.subr.mxu1 %v2186_v35  ;;  %2848 = vrot.lane.b32.xlu1 %v2186_v35, %s4744_s19  ;;  %s329_s19 = sand.u32 1, %s4728_s28  }
 0x873   : > { %4318 = vmatpush3.msra.mxu1 %v2186_v35  ;;  %4319 = vmatprep.mubr.msk.f32.mxu1 %vm1519_vm4, %v5602_v26  ;;  %v4609_v26 = vld [vmem:[%s4889_s22 + $0x28] sm:$0xff]  ;;  %s6300_s9 = scalar_lea.sflag [#allocation4], %s329_s19 }
 0x874   : > { %4320 = vmatmul.mubr.msk.f32.vlgmr.msra.gmra.mxu1 %vm1519_vm4, %v5757_v21  ;;  %4359 = vmatprep.subr.mxu1 %v4607_v17  ;;  %v5987_v21 = vld [vmem:[%s6346_s6 + $0x8] sm:$0xff] }
 0x875   : > { %2882 = vrot.lane.b32.xlu0 %v2191_v20, %s4745_s24  ;;  %4322 = vmatprep.mubr.msk.f32.mxu1 %vm1519_vm4, %v5769_v8  ;;  %v6016_v8 = vld [vmem:[%s6346_s6 + $0x20] sm:$0xff]  ;;  %v3622_v20 = vld [vmem:[%s6346_s6 + $0xb0] sm:$0xff] }
 0x876   : > { %2884 = vrot.lane.b32.xlu1 %v2192_v53, %s4745_s24  ;;  %4360 = vmatpush3.msra.mxu1 %v4607_v17 }
 0x877   : > { %4361 = vmatprep.subr.mxu1 %v4608_v37 }
 0x878   : > { %4323 = vmatmul.mubr.msk.f32.gmra.mxu1 %vm1519_vm4, %v5776_v27 }
 0x879   : > { %2878 = vrot.lane.b32.xlu0 %v2189_v38, %s4745_s24  ;;  %4325 = vmatprep.mubr.msk.f32.mxu1 %vm1519_vm4, %v5788_v59  ;;  %v6060_v59 = vld [vmem:[%s6346_s6 + $0x80] sm:$0xff] }
 0x87a   : > { %2880 = vrot.lane.b32.xlu1 %v2190_v44, %s4745_s24  ;;  %4362 = vmatpush3.msra.mxu1 %v4608_v37 }
 0x87b   : > { %4363 = vmatprep.subr.mxu1 %v4609_v26 }
 0x87c   : > { %4326 = vmatmul.mubr.msk.f32.gmra.mxu1 %vm1519_vm4, %v5795_v36 }
 0x87d   : > { %2874 = vrot.lane.b32.xlu0 %v2187_v30, %s4745_s24  ;;  %4328 = vmatprep.mubr.msk.f32.mxu1 %vm1519_vm4, %v5806_v19 }
 0x87e   : > { %2876 = vrot.lane.b32.xlu1 %v2188_v29, %s4745_s24  ;;  %4364 = vmatpush3.msra.mxu1 %v4609_v26 }
 0x87f   : > { %4365 = vmatprep.subr.mxu1 %v4610_v48 }
 0x880   : > { %4329 = vmatmul.mubr.msk.f32.gmra.mxu1 %vm1519_vm4, %v5820_v11  ;;  %v6097_v11 = vld [vmem:[%s6346_s6 + $0x98] sm:$0xff] }
 0x881   : > { %4366 = vmatpush3.msra.mxu1 %v4610_v48  ;;  %4367 = vmatprep.mubr.msk.f32.mxu1 %vm672_vm1, %v5827_v0  ;;  %v6104_v0 = vld [vmem:[%s6346_s6 + $0xa0] sm:$0xff] }
 0x882   : > { %2872 = vrot.lane.b32.xlu1 %v2186_v35, %s4745_s24  ;;  %2809 = vperm.xlu0 %4478, %v5596_v51   ;;  %v4613_v51 = vld [vmem:[%s6342_s2 + $0x20] sm:$0xff]  ;;  %s3464_s24 = sshll.u32 %s329_s19, 7 }
 0x883   : > { %s6238_s25 = scalar_lea.vmem [#allocation7], %s3464_s24 }
 0x884   : > { %4368 = vmatmul.mubr.msk.f32.vlgmr.msra.gmra.mxu1 %vm672_vm1, %v5838_v43  ;;  %v3621_v43 = vld [vmem:[%s6346_s6 + $0xa8] sm:$0xff]  ;;  %s3372_s10 = sshll.u32 %s6238_s25, 4  ;;  %s6293_s10 = int_to_ptr.vmem [resolvable:$true] %s3372_s10 }
 0x885   : > { %4370 = vmatprep.mubr.msk.f32.mxu1 %vm672_vm1, %v5849_v4  ;;  %v3623_v4 = vld [vmem:[%s6346_s6 + $0xb8] sm:$0xff]  ;;  %s4668_s20 = scalar_lea.vmem %s6293_s10, 2048  ;;  %p4675_p11 = scmp.lt.s32.totalorder %s6293_s10, %s4673_s17 }
 0x886   : > { %2813 = vperm.xlu1 %4479, %v5589_v49   ;;  %2821 = vperm.xlu0 %4478, %v4611_v57   ;;  %v4612_v49 = vld [vmem:[%s6342_s2 + $0x28] sm:$0xff]  ;;  %p4669_p10 = scmp.ne.s32.totalorder %s6293_s10, %s4668_s20  ;;  %p4676_p0 = scmp.lt.s32.totalorder %s4674_s23, %s4668_s20 }
 0x888   : > { %4371 = vmatmul.mubr.msk.f32.gmra.mxu1 %vm672_vm1, %v5856_v56  ;;  %p4670_p12 = pnand %p4669_p10, %p4834_p5  ;;  %p4677_p1 = por %p4676_p0, %p4675_p11 }
 0x889   : > { %4373 = vmatprep.mubr.msk.f32.mxu1 %vm672_vm1, %v5868_v45 }
 0x88a   : > { %2817 = vperm.xlu1 %4479, %v5583_v13   ;;  %2829 = vperm.xlu0 %4478, %v4612_v49   ;;  %v4614_v13 = vld [vmem:[%s6342_s2 + $0x38] sm:$0xff]  ;;  %p4671_p8 = pneg %p4670_p12 }
 0x88c   : > { %4374 = vmatmul.mubr.msk.f32.gmra.mxu1 %vm672_vm1, %v5874_v33  ;;  %p4678_p3 = pnand %p4677_p1, %p4671_p8 }
 0x88d   : > { %4376 = vmatprep.mubr.msk.f32.mxu1 %vm672_vm1, %v2200_v5 }
 0x88e   : > { %2825 = vperm.xlu1 %4479, %v4613_v51   ;;  %2837 = vperm.xlu0 %4478, %v4614_v13  }
 0x890   : > { %4377 = vmatmul.mubr.msk.f32.gmra.mxu1 %vm672_vm1, %v2201_v40 }
 0x892   : > { %2833 = vperm.xlu1 %4479, %v4615_v60  }
 0x8b0   : > { %v2243_v41 = vpop.permute.xlu0 %2242 }
 0x8b1   : > { %4171 = vmatprep.subr.msk.mxu0 %vm3769_vm2, %v2243_v41 }
 0x8b2   : > { %4172 = vmatpush3.msk.msra.mxu0 %vm3769_vm2, %v2243_v41 }
 0x8b4   : > { %v2239_v6 = vpop.permute.xlu0 %2238 }
 0x8b8   : > { %v2241_v2 = vpop.permute.xlu1 %2240 }
 0x8b9   : > { %4173 = vmatprep.subr.msk.mxu0 %vm3769_vm2, %v2241_v2  ;;  %v2235_v1 = vpop.permute.xlu0 %2234 }
 0x8ba   : > { %4174 = vmatpush3.msk.msra.mxu0 %vm3769_vm2, %v2241_v2 }
 0x8bb   : > { %4175 = vmatprep.subr.msk.mxu0 %vm3769_vm2, %v2239_v6 }
 0x8bc   : > { %4176 = vmatpush3.msk.msra.mxu0 %vm3769_vm2, %v2239_v6  ;;  %v2237_v7 = vpop.permute.xlu1 %2236 }
 0x8bd   : > { %4177 = vmatprep.subr.msk.mxu0 %vm3769_vm2, %v2237_v7 }
 0x8be   : > { %4178 = vmatpush3.msk.msra.mxu0 %vm3769_vm2, %v2237_v7 }
 0x8bf   : > { %v2231_v50 = vpop.permute.xlu0 %2230  ;;  %4179 = vmatprep.subr.msk.mxu0 %vm3769_vm2, %v2235_v1 }
 0x8c0   : > { %4180 = vmatpush3.msk.msra.mxu0 %vm3769_vm2, %v2235_v1  ;;  %v2233_v31 = vpop.permute.xlu1 %2232 }
 0x8c1   : > { %4181 = vmatprep.subr.msk.mxu0 %vm3769_vm2, %v2233_v31 }
 0x8c2   : > { %4182 = vmatpush3.msk.msra.mxu0 %vm3769_vm2, %v2233_v31 }
 0x8c3   : > { %v2267_v22 = vpop.permute.xlu0 %2266  ;;  %4183 = vmatprep.subr.msk.mxu0 %vm3769_vm2, %v2231_v50 }
 0x8c4   : > { %4184 = vmatpush3.msk.msra.mxu0 %vm3769_vm2, %v2231_v50  ;;  %v2229_v18 = vpop.permute.xlu1 %2228 }
 0x8c5   : > { %4185 = vmatprep.subr.msk.mxu0 %vm3769_vm2, %v2229_v18 }
 0x8c6   : > { %4186 = vmatpush3.msk.msra.mxu0 %vm3769_vm2, %v2229_v18 }
 0x8c7   : > { %v2263_v28 = vpop.permute.xlu0 %2262  ;;  %4188 = vmatmul.mubr.msk.f32.vlgmr.msra.gmra.mxu0 %vm1519_vm4, %v5987_v21  ;;  %4227 = vmatprep.subr.msk.mxu0 %vm3770_vm3, %v2267_v22 }
 0x8c8   : > { %4228 = vmatpush3.msk.msra.mxu0 %vm3770_vm3, %v2267_v22  ;;  %v2265_v24 = vpop.permute.xlu1 %2264  ;;  %4190 = vmatprep.mubr.msk.f32.mxu0 %vm1519_vm4, %v5994_v9 }
 0x8c9   : > { %4229 = vmatprep.subr.msk.mxu0 %vm3770_vm3, %v2265_v24 }
 0x8ca   : > { %4230 = vmatpush3.msk.msra.mxu0 %vm3770_vm3, %v2265_v24 }
 0x8cb   : > { %v2259_v61 = vpop.permute.xlu0 %2258  ;;  %4191 = vmatmul.mubr.msk.f32.gmra.mxu0 %vm1519_vm4, %v6009_v12  ;;  %4231 = vmatprep.subr.msk.mxu0 %vm3770_vm3, %v2263_v28 }
 0x8cc   : > { %4232 = vmatpush3.msk.msra.mxu0 %vm3770_vm3, %v2263_v28  ;;  %v2261_v27 = vpop.permute.xlu1 %2260  ;;  %4193 = vmatprep.mubr.msk.f32.mxu0 %vm1519_vm4, %v6016_v8 }
 0x8cd   : > { %4233 = vmatprep.subr.msk.mxu0 %vm3770_vm3, %v2261_v27 }
 0x8ce   : > { %4234 = vmatpush3.msk.msra.mxu0 %vm3770_vm3, %v2261_v27 }
 0x8cf   : > { %v2255_v14 = vpop.permute.xlu0 %2254  ;;  %4194 = vmatmul.mubr.msk.f32.gmra.mxu0 %vm1519_vm4, %v6031_v23  ;;  %4235 = vmatprep.subr.msk.mxu0 %vm3770_vm3, %v2259_v61 }
 0x8d0   : > { %4236 = vmatpush3.msk.msra.mxu0 %vm3770_vm3, %v2259_v61  ;;  %v2257_v3 = vpop.permute.xlu1 %2256  ;;  %4196 = vmatprep.mubr.msk.f32.mxu0 %vm1519_vm4, %v6038_v15 }
 0x8d1   : > { %4237 = vmatprep.subr.msk.mxu0 %vm3770_vm3, %v2257_v3 }
 0x8d2   : > { %4238 = vmatpush3.msk.msra.mxu0 %vm3770_vm3, %v2257_v3 }
 0x8d3   : > { %v2863_v25 = vpop.permute.xlu0 %2862  ;;  %4197 = vmatmul.mubr.msk.f32.gmra.mxu0 %vm1519_vm4, %v6053_v58  ;;  %4239 = vmatprep.subr.msk.mxu0 %vm3770_vm3, %v2255_v14 }
 0x8d4   : > { %4240 = vmatpush3.msk.msra.mxu0 %vm3770_vm3, %v2255_v14  ;;  %v2253_v36 = vpop.permute.xlu1 %2252  ;;  %4243 = vmatprep.mubr.msk.f32.mxu0 %vm1519_vm4, %v6060_v59 }
 0x8d5   : > { %4241 = vmatprep.subr.msk.mxu0 %vm3770_vm3, %v2253_v36 }
 0x8d6   : > { %4242 = vmatpush3.msk.msra.mxu0 %vm3770_vm3, %v2253_v36 }
 0x8d7   : > { %v2859_v19 = vpop.permute.xlu0 %2858  ;;  %4244 = vmatmul.mubr.msk.f32.vlgmr.msra.gmra.mxu0 %vm1519_vm4, %v6075_v62  ;;  %4275 = vmatprep.subr.msk.mxu0 %vm3769_vm2, %v2863_v25 }
 0x8d8   : > { %4276 = vmatpush3.msk.msra.mxu0 %vm3769_vm2, %v2863_v25  ;;  %v2861_v63 = vpop.permute.xlu1 %2860  ;;  %4246 = vmatprep.mubr.msk.f32.mxu0 %vm1519_vm4, %v6082_v42 }
 0x8d9   : > { %4277 = vmatprep.subr.msk.mxu0 %vm3769_vm2, %v2861_v63 }
 0x8da   : > { %4278 = vmatpush3.msk.msra.mxu0 %vm3769_vm2, %v2861_v63 }
 0x8db   : > { %v2855_v34 = vpop.permute.xlu0 %2854  ;;  %4247 = vmatmul.mubr.msk.f32.gmra.mxu0 %vm1519_vm4, %v6097_v11  ;;  %4279 = vmatprep.subr.msk.mxu0 %vm3769_vm2, %v2859_v19 }
 0x8dc   : > { %4280 = vmatpush3.msk.msra.mxu0 %vm3769_vm2, %v2859_v19  ;;  %v2857_v16 = vpop.permute.xlu1 %2856  ;;  %4249 = vmatprep.mubr.msk.f32.mxu0 %vm1519_vm4, %v6104_v0 }
 0x8dd   : > { %4281 = vmatprep.subr.msk.mxu0 %vm3769_vm2, %v2857_v16 }
 0x8de   : > { %4282 = vmatpush3.msk.msra.mxu0 %vm3769_vm2, %v2857_v16 }
 0x8df   : > { %v2851_v52 = vpop.permute.xlu0 %2850  ;;  %4250 = vmatmul.mubr.msk.f32.gmra.mxu0 %vm1519_vm4, %v3621_v43  ;;  %4283 = vmatprep.subr.msk.mxu0 %vm3769_vm2, %v2855_v34 }
 0x8e0   : > { %4284 = vmatpush3.msk.msra.mxu0 %vm3769_vm2, %v2855_v34  ;;  %v2853_v53 = vpop.permute.xlu1 %2852  ;;  %4252 = vmatprep.mubr.msk.f32.mxu0 %vm1519_vm4, %v3622_v20 }
 0x8e1   : > { %4285 = vmatprep.subr.msk.mxu0 %vm3769_vm2, %v2853_v53 }
 0x8e2   : > { %4286 = vmatpush3.msk.msra.mxu0 %vm3769_vm2, %v2853_v53 }
 0x8e3   : > { %v2887_v46 = vpop.permute.xlu0 %2886  ;;  %4253 = vmatmul.mubr.msk.f32.gmra.mxu0 %vm1519_vm4, %v3623_v4  ;;  %4287 = vmatprep.subr.msk.mxu0 %vm3769_vm2, %v2851_v52 }
 0x8e4   : > { %4288 = vmatpush3.msk.msra.mxu0 %vm3769_vm2, %v2851_v52  ;;  %v2849_v56 = vpop.permute.xlu1 %2848  ;;  %4291 = vmatprep.mubr.msk.f32.mxu0 %vm1519_vm4, %v5717_v10 }
 0x8e5   : > { %4289 = vmatprep.subr.msk.mxu0 %vm3769_vm2, %v2849_v56 }
 0x8e6   : > { %4290 = vmatpush3.msk.msra.mxu0 %vm3769_vm2, %v2849_v56 }
 0x8e7   : > { %v2883_v38 = vpop.permute.xlu0 %2882  ;;  %4292 = vmatmul.mubr.msk.f32.vlgmr.msra.gmra.mxu0 %vm1519_vm4, %v5987_v21  ;;  %4331 = vmatprep.subr.msk.mxu0 %vm3770_vm3, %v2887_v46 }
 0x8e8   : > { %4332 = vmatpush3.msk.msra.mxu0 %vm3770_vm3, %v2887_v46  ;;  %v2885_v55 = vpop.permute.xlu1 %2884  ;;  %4294 = vmatprep.mubr.msk.f32.mxu0 %vm1519_vm4, %v5994_v9 }
 0x8e9   : > { %4333 = vmatprep.subr.msk.mxu0 %vm3770_vm3, %v2885_v55 }
 0x8ea   : > { %4334 = vmatpush3.msk.msra.mxu0 %vm3770_vm3, %v2885_v55 }
 0x8eb   : > { %4295 = vmatmul.mubr.msk.f32.gmra.mxu0 %vm1519_vm4, %v6009_v12  ;;  %4335 = vmatprep.subr.msk.mxu0 %vm3770_vm3, %v2883_v38  ;;  %v2879_v10 = vpop.permute.xlu0 %2878 }
 0x8ec   : > { %4336 = vmatpush3.msk.msra.mxu0 %vm3770_vm3, %v2883_v38  ;;  %v2881_v44 = vpop.permute.xlu1 %2880  ;;  %4297 = vmatprep.mubr.msk.f32.mxu0 %vm1519_vm4, %v6016_v8 }
 0x8ed   : > { %4337 = vmatprep.subr.msk.mxu0 %vm3770_vm3, %v2881_v44 }
 0x8ee   : > { %4338 = vmatpush3.msk.msra.mxu0 %vm3770_vm3, %v2881_v44 }
 0x8ef   : > { %4298 = vmatmul.mubr.msk.f32.gmra.mxu0 %vm1519_vm4, %v6031_v23  ;;  %4339 = vmatprep.subr.msk.mxu0 %vm3770_vm3, %v2879_v10  ;;  %v2875_v39 = vpop.permute.xlu0 %2874 }
 0x8f0   : > { %4340 = vmatpush3.msk.msra.mxu0 %vm3770_vm3, %v2879_v10  ;;  %v2877_v45 = vpop.permute.xlu1 %2876  ;;  %4300 = vmatprep.mubr.msk.f32.mxu0 %vm1519_vm4, %v6038_v15 }
 0x8f1   : > { %4341 = vmatprep.subr.msk.mxu0 %vm3770_vm3, %v2877_v45 }
 0x8f2   : > { %4342 = vmatpush3.msk.msra.mxu0 %vm3770_vm3, %v2877_v45 }
 0x8f3   : > { %4301 = vmatmul.mubr.msk.f32.gmra.mxu0 %vm1519_vm4, %v6053_v58  ;;  %4343 = vmatprep.subr.msk.mxu0 %vm3770_vm3, %v2875_v39 }
 0x8f4   : > { %4344 = vmatpush3.msk.msra.mxu0 %vm3770_vm3, %v2875_v39  ;;  %v2873_v33 = vpop.permute.xlu1 %2872  ;;  %4347 = vmatprep.mubr.msk.f32.mxu0 %vm1519_vm4, %v6060_v59 }
 0x8f5   : > { %4345 = vmatprep.subr.msk.mxu0 %vm3770_vm3, %v2873_v33 }
 0x8f6   : > { %4346 = vmatpush3.msk.msra.mxu0 %vm3770_vm3, %v2873_v33 }
 0x8f7   : > { %4348 = vmatmul.mubr.msk.f32.vlgmr.msra.gmra.mxu0 %vm1519_vm4, %v6075_v62 }
 0x8f8   : > { %4350 = vmatprep.mubr.msk.f32.mxu0 %vm1519_vm4, %v6082_v42 }
 0x8fb   : > { %4351 = vmatmul.mubr.msk.f32.gmra.mxu0 %vm1519_vm4, %v6097_v11 }
 0x8fc   : > { %4353 = vmatprep.mubr.msk.f32.mxu0 %vm1519_vm4, %v6104_v0 }
 0x8fd   : > { %v6219_v22 = vpop.permute.xlu0 %2809 }
 0x8ff   : > { %4354 = vmatmul.mubr.msk.f32.gmra.mxu0 %vm1519_vm4, %v3621_v43 }
 0x900   : > { %4356 = vmatprep.mubr.msk.f32.mxu0 %vm1519_vm4, %v3622_v20 }
 0x901   : > { %v6224_v24 = vpop.permute.xlu1 %2813  ;;  %v6230_v23 = vpop.permute.xlu0 %2821 }
 0x903   : > { %4357 = vmatmul.mubr.msk.f32.gmra.mxu0 %vm1519_vm4, %v3623_v4 }
 0x905   : > { %v6232_v59 = vpop.permute.xlu1 %2817  ;;  %v6241_v20 = vpop.permute.xlu0 %2829 }
 0x909   : > { %v6247_v55 = vpop.permute.xlu1 %2825 }
 0x914   : > { %v4217_v54 = vpop.f32.mrf.mxu1 }
 0x916   : > { %v2495_v30 = vpop.f32.mrf.mxu1 }
 0x918   : > { %v4220_v29 = vpop.f32.mrf.mxu1 }
 0x91a   : > { %v2505_v5 = vpop.f32.mrf.mxu1 }
 0x91c   : > { %v4223_v47 = vpop.f32.mrf.mxu1 }
 0x91e   : > { %v2515_v40 = vpop.f32.mrf.mxu1 }
 0x920   : > { %v4226_v35 = vpop.f32.mrf.mxu1 }
 0x922   : > { %v6209_v17 = vpop.f32.mrf.mxu1 }
 0x924   : > { %v4265_v37 = vpop.f32.mrf.mxu1 }
 0x926   : > { %v2761_v26 = vpop.f32.mrf.mxu1 }
 0x928   : > { %v4268_v48 = vpop.f32.mrf.mxu1 }
 0x92a   : > { %v2771_v32 = vpop.f32.mrf.mxu1 }
 0x92c   : > { %v4271_v57 = vpop.f32.mrf.mxu1 }
 0x92e   : > { %v2781_v49 = vpop.f32.mrf.mxu1 }
 0x930   : > { %v6211_v51 = vpop.f32.mrf.mxu1 }
 0x932   : > { %v6213_v60 = vpop.f32.mrf.mxu1 }
 0x934   : > { %v6215_v2 = vpop.f32.mrf.mxu1 }
 0x936   : > { %v6217_v50 = vpop.f32.mrf.mxu1 }
 0x938   : > { %v6221_v21 = vpop.f32.mrf.mxu1 }
 0x93a   : > { %v6226_v8 = vpop.f32.mrf.mxu1 }
 0x93c   : > { %v6234_v36 = vpop.f32.mrf.mxu1 }
 0x93e   : > { %v6243_v53 = vpop.f32.mrf.mxu1 }
 0x987   : > { %v4189_v13 = vpop.f32.mrf.mxu0 }
 0x988   : > { %v2501_v28 = vadd.f32 %v4217_v54, %v4189_v13 }
 0x989   : > { %v2366_v41 = vpop.f32.mrf.mxu0 }
 0x98a   : > { %v2496_v61 = vadd.f32 %v2495_v30, %v2366_v41  ;;  %v4330_v30 = vpop.f32.mrf.mxu1 }
 0x98b   : > { %v4192_v6 = vpop.f32.mrf.mxu0 }
 0x98c   : > { %v2511_v14 = vadd.f32 %v4220_v29, %v4192_v6 }
 0x98d   : > { %v2376_v1 = vpop.f32.mrf.mxu0 }
 0x98e   : > { %v2506_v62 = vadd.f32 %v2505_v5, %v2376_v1 }
 0x98f   : > { %v4195_v7 = vpop.f32.mrf.mxu0 }
 0x990   : > { %v2521_v0 = vadd.f32 %v4223_v47, %v4195_v7 }
 0x991   : > { %v2386_v31 = vpop.f32.mrf.mxu0 }
 0x992   : > { %v2516_v4 = vadd.f32 %v2515_v40, %v2386_v31 }
 0x993   : > { %v4198_v18 = vpop.f32.mrf.mxu0 }
 0x994   : > { %v2531_v44 = vadd.f32 %v4226_v35, %v4198_v18 }
 0x995   : > { %v2396_v9 = vpop.f32.mrf.mxu0 }
 0x996   : > { %v2526_v29 = vadd.f32 %v6209_v17, %v2396_v9  ;;  %v3097_v17 = vpop.f32.mrf.mxu1 }
 0x997   : > { %v4245_v12 = vpop.f32.mrf.mxu0 }
 0x998   : > { %v2664_v27 = vadd.f32 %v4245_v12, %v2501_v28  ;;  %v4369_v31 = vpop.f32.mrf.mxu1 }
 0x999   : > { %v2624_v15 = vpop.f32.mrf.mxu0 }
 0x99a   : > { %v2801_v3 = vadd.f32 %v4265_v37, %v2664_v27  ;;  %v2663_v58 = vadd.f32 %v2624_v15, %v2496_v61  ;;  %v3285_v28 = vpop.f32.mrf.mxu1 }
 0x99b   : > { %v4248_v25 = vpop.f32.mrf.mxu0 }
 0x99c   : > { %v2800_v42 = vadd.f32 %v2761_v26, %v2663_v58  ;;  %v2666_v19 = vadd.f32 %v4248_v25, %v2511_v14  ;;  %v2841_v63 = vadd.f32 %v6224_v24, %v2801_v3  ;;  %v6254_v26 = vpop.permute.xlu0 %2837  ;;  %v4372_v61 = vpop.f32.mrf.mxu1 }
 0x99d   : > { %v2634_v11 = vpop.f32.mrf.mxu0 }
 0x99e   : > { %v2840_v34 = vadd.f32 %v6219_v22, %v2800_v42  ;;  %v2803_v16 = vadd.f32 %v4268_v48, %v2666_v19  ;;  %3341 = vst [vmem:[%s6238_s25 + $0x8] sm:$0xff] %v2841_v63  ;;  %v2665_v43 = vadd.f32 %v2634_v11, %v2506_v62  ;;  %v3295_v14 = vpop.f32.mrf.mxu1 }
 0x99f   : > { %v4251_v52 = vpop.f32.mrf.mxu0 }
 0x9a0   : > { %3340 = vst [vmem:[%s6238_s25] sm:$0xff] %v2840_v34  ;;  %v2802_v46 = vadd.f32 %v2771_v32, %v2665_v43  ;;  %v2843_v56 = vadd.f32 %v6230_v23, %v2803_v16  ;;  %v2668_v38 = vadd.f32 %v4251_v52, %v2521_v0  ;;  %v4375_v11 = vpop.f32.mrf.mxu1 }
 0x9a1   : > { %v2644_v10 = vpop.f32.mrf.mxu0 }
 0x9a2   : > { %3343 = vst [vmem:[%s6238_s25 + $0x18] sm:$0xff] %v2843_v56  ;;  %v2805_v45 = vadd.f32 %v4271_v57, %v2668_v38  ;;  %v2667_v39 = vadd.f32 %v2644_v10, %v2516_v4  ;;  %v2842_v33 = vadd.f32 %v6232_v59, %v2802_v46  ;;  %v6259_v57 = vpop.permute.xlu1 %2833  ;;  %v3305_v56 = vpop.f32.mrf.mxu1 }
 0x9a3   : > { %v4254_v54 = vpop.f32.mrf.mxu0 }
 0x9a4   : > { %v2804_v5 = vadd.f32 %v2781_v49, %v2667_v39  ;;  %3342 = vst [vmem:[%s6238_s25 + $0x10] sm:$0xff] %v2842_v33  ;;  %v2845_v47 = vadd.f32 %v6241_v20, %v2805_v45  ;;  %v2670_v40 = vadd.f32 %v4254_v54, %v2531_v44  ;;  %v4378_v54 = vpop.f32.mrf.mxu1 }
 0x9a5   : > { %v2654_v37 = vpop.f32.mrf.mxu0 }
 0x9a6   : > { %3345 = vst [vmem:[%s6238_s25 + $0x28] sm:$0xff] %v2845_v47  ;;  %v2669_v35 = vadd.f32 %v2654_v37, %v2526_v29  ;;  %v2844_v48 = vadd.f32 %v6247_v55, %v2804_v5  ;;  %v2807_v32 = vadd.f32 %v6211_v51, %v2670_v40  ;;  %v3315_v37 = vpop.f32.mrf.mxu1 }
 0x9a7   : > { %v4293_v13 = vpop.f32.mrf.mxu0 }
 0x9a8   : > { %v2806_v49 = vadd.f32 %v6213_v60, %v2669_v35  ;;  %3344 = vst [vmem:[%s6238_s25 + $0x20] sm:$0xff] %v2844_v48  ;;  %v2847_v41 = vadd.f32 %v6254_v26, %v2807_v32  ;;  %v3073_v15 = vadd.f32 %v6215_v2, %v4293_v13 }
 0x9a9   : > { %v2962_v6 = vpop.f32.mrf.mxu0 }
 0x9aa   : > { %3347 = vst [vmem:[%s6238_s25 + $0x38] sm:$0xff] %v2847_v41  ;;  %v2846_v1 = vadd.f32 %v6259_v57, %v2806_v49  ;;  %v3068_v3 = vadd.f32 %v6217_v50, %v2962_v6 }
 0x9ab   : > { %v4296_v7 = vpop.f32.mrf.mxu0 }
 0x9ac   : > { %3346 = vst [vmem:[%s6238_s25 + $0x30] sm:$0xff] %v2846_v1  ;;  %v3083_v62 = vadd.f32 %v6221_v21, %v4296_v7 }
 0x9ad   : > { %v2972_v18 = vpop.f32.mrf.mxu0 }
 0x9ae   : > { %v3078_v0 = vadd.f32 %v6226_v8, %v2972_v18 }
 0x9af   : > { %v4299_v9 = vpop.f32.mrf.mxu0 }
 0x9b0   : > { %v3093_v52 = vadd.f32 %v6234_v36, %v4299_v9 }
 0x9b1   : > { %v2982_v51 = vpop.f32.mrf.mxu0 }
 0x9b2   : > { %v3088_v38 = vadd.f32 %v6243_v53, %v2982_v51 }
 0x9b3   : > { %v4302_v12 = vpop.f32.mrf.mxu0 }
 0x9b4   : > { %v3103_v45 = vadd.f32 %v4330_v30, %v4302_v12 }
 0x9b5   : > { %v2992_v27 = vpop.f32.mrf.mxu0 }
 0x9b6   : > { %v3098_v29 = vadd.f32 %v3097_v17, %v2992_v27 }
 0x9b7   : > { %v4349_v60 = vpop.f32.mrf.mxu0 }
 0x9b8   : > { %v3212_v58 = vadd.f32 %v4349_v60, %v3073_v15 }
 0x9b9   : > { %v3172_v25 = vpop.f32.mrf.mxu0 }
 0x9ba   : > { %v3325_v42 = vadd.f32 %v4369_v31, %v3212_v58  ;;  %v3211_v19 = vadd.f32 %v3172_v25, %v3068_v3 }
 0x9bb   : > { %v4352_v63 = vpop.f32.mrf.mxu0 }
 0x9bc   : > { %v3333_v34 = vadd.f32 %v3325_v42, %v6224_v24  ;;  %v3324_v16 = vadd.f32 %v3285_v28, %v3211_v19  ;;  %v3214_v2 = vadd.f32 %v4352_v63, %v3083_v62 }
 0x9bd   : > { %v3182_v43 = vpop.f32.mrf.mxu0 }
 0x9be   : > { %3753 = vst [vmem:[%s6238_s25 + $0x48] sm:$0xff] %v3333_v34  ;;  %v3332_v50 = vadd.f32 %v3324_v16, %v6219_v22  ;;  %v3327_v4 = vadd.f32 %v4372_v61, %v3214_v2  ;;  %v3213_v21 = vadd.f32 %v3182_v43, %v3078_v0 }
 0x9bf   : > { %v4355_v46 = vpop.f32.mrf.mxu0 }
 0x9c0   : > { %3752 = vst [vmem:[%s6238_s25 + $0x40] sm:$0xff] %v3332_v50  ;;  %v3335_v8 = vadd.f32 %v3327_v4, %v6230_v23  ;;  %v3326_v24 = vadd.f32 %v3295_v14, %v3213_v21  ;;  %v3216_v10 = vadd.f32 %v4355_v46, %v3093_v52 }
 0x9c1   : > { %v3192_v44 = vpop.f32.mrf.mxu0 }
 0x9c2   : > { %3755 = vst [vmem:[%s6238_s25 + $0x58] sm:$0xff] %v3335_v8  ;;  %v3334_v36 = vadd.f32 %v3326_v24, %v6232_v59  ;;  %v3329_v22 = vadd.f32 %v4375_v11, %v3216_v10  ;;  %v3215_v39 = vadd.f32 %v3192_v44, %v3088_v38 }
 0x9c3   : > { %v4358_v33 = vpop.f32.mrf.mxu0 }
 0x9c4   : > { %3754 = vst [vmem:[%s6238_s25 + $0x50] sm:$0xff] %v3334_v36  ;;  %v3337_v53 = vadd.f32 %v3329_v22, %v6241_v20  ;;  %v3328_v23 = vadd.f32 %v3305_v56, %v3215_v39  ;;  %v3218_v5 = vadd.f32 %v4358_v33, %v3103_v45 }
 0x9c5   : > { %v3202_v47 = vpop.f32.mrf.mxu0 }
 0x9c6   : > { %3757 = vst [vmem:[%s6238_s25 + $0x68] sm:$0xff] %v3337_v53  ;;  %v3336_v30 = vadd.f32 %v3328_v23, %v6247_v55  ;;  %v3331_v59 = vadd.f32 %v4378_v54, %v3218_v5  ;;  %v3217_v40 = vadd.f32 %v3202_v47, %v3098_v29 }
 0x9c8   : > { %3756 = vst [vmem:[%s6238_s25 + $0x60] sm:$0xff] %v3336_v30  ;;  %v3339_v35 = vadd.f32 %v3331_v59, %v6254_v26  ;;  %v3330_v48 = vadd.f32 %v3315_v37, %v3217_v40 }
 0x9ca   : > { %3759 = vst [vmem:[%s6238_s25 + $0x78] sm:$0xff] %v3339_v35  ;;  %v3338_v20 = vadd.f32 %v3330_v48, %v6259_v57 }
 0x9cc   : > { %3758 = vst [vmem:[%s6238_s25 + $0x70] sm:$0xff] %v3338_v20 }
 0x9cd   : > { %4681 = shalt.err (!%p4678_p3)
}
 0x9ce   : > { %s4682_s22 = scalar_lea.hbm %s6291_s18, 2048  ;;  %s4686_s25 = scalar_lea.hbm %s6348_s8, 8192 }
 0x9cf   : > { %p4683_p2 = scmp.ne.s32.totalorder %s6291_s18, %s4682_s22  ;;  %p4687_p7 = scmp.lt.s32.totalorder %s6291_s18, %s6348_s8 }
 0x9d0   : > { %p4688_p6 = scmp.lt.s32.totalorder %s4686_s25, %s4682_s22 }
 0x9d1   : > { %p4684_p4 = pnand %p4683_p2, %p4834_p5 }
 0x9d2   : > { %p4689_p9 = por %p4688_p6, %p4687_p7 }
 0x9d3   : > { %p4685_p13 = pneg %p4684_p4 }
 0x9d5   : > { %p4690_p10 = pnand %p4689_p9, %p4685_p13 }
 0x9d7   : > { %4693 = shalt.err (!%p4690_p10)
}
 0x9d8   : > { %s4749_s13 = smov 128   ;;  %s4750_s20 = smov 8  }
 0x9d9   : > { %4387 = dma.vmem_to_hbm [thread:$0]  (%p4834_p5), %s6293_s10, 2048, %s6291_s18, %s6300_s9, %s4749_s13, %s4749_s13, %s4750_s20  }
 0x9da PF: > { %p4404_p12 = scmp.ge.s32.totalorder %s4736_s30, 2  ;;  %s3387_s21 = sand.u32 1, %s4724_s27  }
 0x9db   : > { %p6358_p8 = scmp.ne.s32.totalorder %s6351_s16, 0  ;;  %s3388_s17 = scalar_lea.sflag [#allocation4], %s3387_s21 }
 0x9dd   : > { %p4397_p11 = pnand %p4404_p12, %p6358_p8 }
 0x9df   : > { %p4398_p0 = pneg %p4397_p11 }
 0x9e1   : > { %4719 = dma.done.wait (%p4398_p0), %s3388_s17, 2048  }
 0x9e2   : > { %4721 = vsyncadd (%p4398_p0), %s3388_s17, 4294965248  ;;  %p20_p1 = scmp.ge.s32.totalorder %s4821_s11, 6   ;;  %s6359_s27 = smov %s4728_s28 }
 0x9e3   : > { %s6360_s28 = smov %s4732_s29  ;;  %s6361_s29 = smov %s4832_s14 }
 0x9e4   : > { %s6362_s30 = smov %s4821_s11  ;;  %22 = sbr.rel (!%p20_p1) target bundleno = 5 (0x5), region = 102 }
 0x9e9   :  { %3393 = vsyncpa [#allocation3], 1 }
 0x9ea   :  { %3395 = vsyncpa [#allocation3 + $0x1], 1 }
 0x9eb   :  { %3396 = vsyncpa [#allocation6], 1 }
 0x9ec   :  { %3397 = vsyncpa [#allocation4], 1 }
 0x9ed   :  { %3399 = vsyncpa [#allocation4 + $0x1], 1 }

</bundles_post_ra>
